<compile_context>
chip_gen: v7x
topology: tpu7x:2x2x1
jax: 0.10.0
libtpu: 0.0.40
codegen_flags: <defaults>
</compile_context>

<pallas_src>
import functools

import jax
import jax.numpy as jnp
from jax import lax
from jax.experimental import pallas as pl
from jax.experimental.pallas import tpu as pltpu


# ----------------------------------------------------------------------------
# In-kernel helpers (VPU/EUP only — guaranteed Mosaic lowerings).
# ----------------------------------------------------------------------------
def _erf_poly(x):
    # Abramowitz & Stegun 7.1.26, |error| <= 1.5e-7; uses only exp/mul/add.
    a1, a2, a3, a4, a5 = (0.254829592, -0.284496736, 1.421413741,
                          -1.453152027, 1.061405429)
    p = 0.3275911
    ax = jnp.abs(x)
    t = 1.0 / (1.0 + p * ax)
    poly = t * (a1 + t * (a2 + t * (a3 + t * (a4 + t * a5))))
    y = 1.0 - poly * jnp.exp(-ax * ax)
    return jnp.where(x >= 0.0, y, -y)


def _gelu_exact(x):
    # Matches nn.GELU() (erf-based), not the tanh approximation.
    return 0.5 * x * (1.0 + _erf_poly(x * 0.7071067811865476))


# ----------------------------------------------------------------------------
# Fused SwinTransformerBlock kernel: one grid step == one batch element.
# ----------------------------------------------------------------------------
def _swin_block_kernel(x_ref, norms_ref, wqkv_ref, bqkv_ref, bm_ref,
                       wproj_ref, bproj_ref, fc1w_ref, fc1b_ref,
                       fc2w_ref, fc2b_ref, o_ref, *, num_heads, eps=1e-5):
    x = x_ref[0]                                   # (L, C) f32
    L, C = x.shape
    hd = C // num_heads

    def layer_norm(v, w_row, b_row):               # f32 VPU math
        mu = jnp.mean(v, axis=-1, keepdims=True)
        d = v - mu
        var = jnp.mean(d * d, axis=-1, keepdims=True)
        return d * lax.rsqrt(var + eps) * w_row + b_row

    n1w = norms_ref[0:1, :]
    n1b = norms_ref[1:2, :]
    n2w = norms_ref[2:3, :]
    n2b = norms_ref[3:4, :]

    # ---- attention branch (roll + window partition are folded into bm) ----
    h = layer_norm(x, n1w, n1b)
    qkv = jnp.dot(h.astype(jnp.bfloat16), wqkv_ref[...],
                  preferred_element_type=jnp.float32) + bqkv_ref[...]   # (L,3C)

    attn = jnp.zeros((L, C), jnp.float32)
    for hh in range(num_heads):                    # static, tiny head loop
        qh = qkv[:, hh * hd:(hh + 1) * hd].astype(jnp.bfloat16)          # scale pre-folded
        kh = qkv[:, C + hh * hd:C + (hh + 1) * hd].astype(jnp.bfloat16)
        vh = qkv[:, 2 * C + hh * hd:2 * C + (hh + 1) * hd].astype(jnp.bfloat16)

        # q @ k^T, hd axes contracted directly (no explicit transpose).
        s = lax.dot_general(qh, kh, (((1,), (1,)), ((), ())),
                            preferred_element_type=jnp.float32)          # (L, L)
        # rel-pos bias + shift mask + (rolled) window mask, precomputed.
        s = s + bm_ref[hh]

        # Per-window softmax == full-row softmax: off-window entries carry
        # -1e9 and underflow to exactly 0 after exp.
        s = s - jnp.max(s, axis=-1, keepdims=True)
        e = jnp.exp(s)
        denom = jnp.sum(e, axis=-1, keepdims=True)
        inv = pl.reciprocal(denom, approx=True)            # EUP
        inv = inv * (2.0 - denom * inv)                    # one Newton step
        p = (e * inv).astype(jnp.bfloat16)

        oh = jnp.dot(p, vh, preferred_element_type=jnp.float32)          # (L, hd)
        # Per-head slice of W_proj accumulated on the contraction axis ==
        # concat-then-matmul, without a lane concat.
        attn = attn + jnp.dot(oh.astype(jnp.bfloat16), wproj_ref[hh],
                              preferred_element_type=jnp.float32)

    x1 = x + attn + bproj_ref[...]                 # residual 1 (drop_path = id)

    # ---- MLP branch ----
    h2 = layer_norm(x1, n2w, n2b)
    m = jnp.dot(h2.astype(jnp.bfloat16), fc1w_ref[...],
                preferred_element_type=jnp.float32) + fc1b_ref[...]      # (L, H)
    m = _gelu_exact(m)
    y = jnp.dot(m.astype(jnp.bfloat16), fc2w_ref[...],
                preferred_element_type=jnp.float32) + fc2b_ref[...]      # (L, C)

    o_ref[0] = (x1 + y).astype(o_ref.dtype)        # single lane-narrow store


# ----------------------------------------------------------------------------
# Hoisted (build-once) constants.
# ----------------------------------------------------------------------------
def _relative_position_bias(table, window_size, num_heads):
    # Faithful to the module, including the coords_flatten[:, :7] truncation.
    ws = window_size
    coords = jnp.stack(
        jnp.meshgrid(jnp.arange(ws), jnp.arange(ws), indexing="ij"))   # (2,ws,ws)
    coords_flatten = coords.reshape(2, -1)[:, :7]                      # (2,7)
    rel = coords_flatten[:, :, None] - coords_flatten[:, None, :]      # (2,7,7)
    rel = jnp.transpose(rel, (1, 2, 0))                                # (7,7,2)
    idx = (rel[..., 0] + ws - 1) * (2 * ws - 1) + (rel[..., 1] + ws - 1)
    bias = table[idx.reshape(-1)].reshape(ws, ws, num_heads)
    return jnp.transpose(bias, (2, 0, 1)).astype(jnp.float32)          # (nH,7,7)


def make_shift_mask(L, window_size, shift_size):
    idx = jnp.arange(L)
    cnt = jnp.where(idx < L - window_size, 0.0,
                    jnp.where(idx < L - shift_size, 1.0, 2.0)).astype(jnp.float32)
    mw = cnt.reshape(L // window_size, window_size)          # (nW, ws)
    diff = mw[:, None, :] - mw[:, :, None]                   # (nW, ws, ws)
    return jnp.where(diff != 0, -100.0, 0.0).astype(jnp.float32)


def build_fused_biasmask(rel_bias_table, L, window_size, shift, num_heads):
    """Combined (nH, L, L) additive term, in ORIGINAL (un-rolled) coords.

    Attention is permutation-equivariant, so roll(-s) -> windowed attention ->
    roll(+s) equals attention on the un-rolled sequence with the bias, shift
    mask and block-diagonal window mask permuted by the roll.  Off-window
    entries get -1e9 (-> exactly 0 after softmax).
    """
    ws = window_size
    nW = L // ws
    bias = _relative_position_bias(rel_bias_table, ws, num_heads)      # (nH,ws,ws)
    sm = (make_shift_mask(L, ws, shift) if shift > 0
          else jnp.zeros((nW, ws, ws), jnp.float32))                   # (nW,ws,ws)
    p = jnp.arange(L)
    r = (p - shift) % L                # rolled position of original token p
    w = r // ws                        # its window
    t = r % ws                         # its within-window index
    same = w[:, None] == w[None, :]                                    # (L, L)
    bias_pp = bias[:, t[:, None], t[None, :]]                          # (nH,L,L)
    sm_pp = sm[w[:, None], t[:, None], t[None, :]]                     # (L, L)
    out = jnp.where(same[None], bias_pp + sm_pp[None], jnp.float32(-1e9))
    return out.astype(jnp.float32)


def prepare_block(blk, L):
    """Hoist every param-derived constant out of the forward path."""
    C = blk["norm1_w"].shape[0]
    nH = blk["num_heads"]
    hd = C // nH
    ws = blk["window_size"]
    shift = blk["shift_size"]
    scale = hd ** -0.5
    a = blk["attn"]

    # Fold the qk scale into the Q columns of W_qkv^T and b_qkv.
    col_scale = jnp.concatenate([jnp.full((C,), scale, jnp.float32),
                                 jnp.ones((2 * C,), jnp.float32)])
    wqkv_t = (a["w_qkv"].T * col_scale[None, :]).astype(jnp.bfloat16)   # (C,3C)
    bqkv = (a["b_qkv"] * col_scale).reshape(1, 3 * C).astype(jnp.float32)

    m = blk["mlp"]
    return {
        "num_heads": nH,
        "norms": jnp.stack([blk["norm1_w"], blk["norm1_b"],
                            blk["norm2_w"], blk["norm2_b"]], 0).astype(jnp.float32),
        "wqkv_t": wqkv_t,
        "bqkv": bqkv,
        "biasmask": build_fused_biasmask(a["rel_bias_table"], L, ws, shift, nH),
        "wproj_h": a["w_proj"].T.reshape(nH, hd, C).astype(jnp.bfloat16),
        "bproj": a["b_proj"].reshape(1, C).astype(jnp.float32),
        "fc1_w_t": m["fc1_w"].T.astype(jnp.bfloat16),                   # (C, H)
        "fc1_b": m["fc1_b"].reshape(1, -1).astype(jnp.float32),
        "fc2_w_t": m["fc2_w"].T.astype(jnp.bfloat16),                   # (H, C)
        "fc2_b": m["fc2_b"].reshape(1, -1).astype(jnp.float32),
    }


# ----------------------------------------------------------------------------
# pallas_call wrapper: one fused call per block, grid over batch ("parallel").
# ----------------------------------------------------------------------------
def swin_block_fused(x, p):
    B, L, C = x.shape
    nH = p["num_heads"]
    hd = C // nH
    H = p["fc1_b"].shape[-1]

    kernel = functools.partial(_swin_block_kernel, num_heads=nH)
    return pl.pallas_call(
        kernel,
        out_shape=jax.ShapeDtypeStruct((B, L, C), x.dtype),
        grid=(B,),
        in_specs=[
            pl.BlockSpec((1, L, C), lambda b: (b, 0, 0)),        # x (per batch)
            pl.BlockSpec((4, C), lambda b: (0, 0)),              # LN params
            pl.BlockSpec((C, 3 * C), lambda b: (0, 0)),          # Wqkv^T (bf16)
            pl.BlockSpec((1, 3 * C), lambda b: (0, 0)),          # bqkv
            pl.BlockSpec((nH, L, L), lambda b: (0, 0, 0)),       # bias+mask
            pl.BlockSpec((nH, hd, C), lambda b: (0, 0, 0)),      # Wproj^T heads
            pl.BlockSpec((1, C), lambda b: (0, 0)),              # bproj
            pl.BlockSpec((C, H), lambda b: (0, 0)),              # fc1 W^T (bf16)
            pl.BlockSpec((1, H), lambda b: (0, 0)),              # fc1 b
            pl.BlockSpec((H, C), lambda b: (0, 0)),              # fc2 W^T (bf16)
            pl.BlockSpec((1, C), lambda b: (0, 0)),              # fc2 b
        ],
        out_specs=pl.BlockSpec((1, L, C), lambda b: (b, 0, 0)),
        compiler_params=pltpu.CompilerParams(
            dimension_semantics=("parallel",)),                  # v7x: 2 TCs
    )(x, p["norms"], p["wqkv_t"], p["bqkv"], p["biasmask"],
      p["wproj_h"], p["bproj"], p["fc1_w_t"], p["fc1_b"],
      p["fc2_w_t"], p["fc2_b"])


def basic_layer_pallas(x, prepared_blocks):
    for p in prepared_blocks:
        x = swin_block_fused(x, p)
    return x                                                     # downsample=None


# ----------------------------------------------------------------------------
# Pure-JAX reference mirroring the PyTorch forward exactly (for verification).
# ----------------------------------------------------------------------------
def _layer_norm_ref(x, w, b, eps=1e-5):
    mu = jnp.mean(x, axis=-1, keepdims=True)
    var = jnp.mean(jnp.square(x - mu), axis=-1, keepdims=True)
    return (x - mu) * lax.rsqrt(var + eps) * w + b


def _mlp_ref(x, p):
    h = x @ p["fc1_w"].T + p["fc1_b"]
    h = jax.nn.gelu(h, approximate=False)
    return h @ p["fc2_w"].T + p["fc2_b"]


def window_attention_ref(x, params, *, num_heads, window_size, mask=None):
    B_, N, C = x.shape
    hd = C // num_heads
    scale = hd ** -0.5
    qkv = x @ params["w_qkv"].T + params["b_qkv"]
    qkv = qkv.reshape(B_, N, 3, num_heads, hd).transpose(2, 0, 3, 1, 4)
    q, k, v = qkv[0] * scale, qkv[1], qkv[2]
    attn = jnp.einsum("bhnd,bhmd->bhnm", q, k)
    bias = _relative_position_bias(params["rel_bias_table"], window_size, num_heads)
    attn = attn + bias[None]
    if mask is not None:
        nW = mask.shape[0]
        attn = attn.reshape(B_ // nW, nW, num_heads, N, N) + mask[None, :, None]
        attn = attn.reshape(-1, num_heads, N, N)
    attn = jax.nn.softmax(attn, axis=-1)
    out = jnp.einsum("bhnm,bhmd->bhnd", attn, v)
    out = out.transpose(0, 2, 1, 3).reshape(B_, N, C)
    return out @ params["w_proj"].T + params["b_proj"]


def swin_block_ref(x, blk):
    B, L, C = x.shape
    ws, shift = blk["window_size"], blk["shift_size"]
    shortcut = x
    h = _layer_norm_ref(x, blk["norm1_w"], blk["norm1_b"])
    if shift > 0:
        h = jnp.roll(h, -shift, axis=1)
    xw = h.reshape(B * (L // ws), ws, C)                     # window_partition
    aw = window_attention_ref(xw, blk["attn"], num_heads=blk["num_heads"],
                              window_size=ws, mask=blk["attn_mask"])
    h = aw.reshape(B, L, C)                                  # window_reverse
    if shift > 0:
        h = jnp.roll(h, shift, axis=1)
    x = shortcut + h
    x = x + _mlp_ref(_layer_norm_ref(x, blk["norm2_w"], blk["norm2_b"]), blk["mlp"])
    return x


def basic_layer_ref(x, blocks):
    for blk in blocks:
        x = swin_block_ref(x, blk)
    return x


# ----------------------------------------------------------------------------
# Demo + verification.
# ----------------------------------------------------------------------------
if __name__ == "__main__":
    dim = 32
    num_heads = 4
    window_size = 7              # module's index math requires window_size == 7
    input_resolution = 28        # L: 4 windows of 7 tokens
    depth = 2                    # block 0: no shift, block 1: shift = 3
    batch = 2
    mlp_hidden = int(dim * 4.0)

    key = jax.random.PRNGKey(0)

    def normal(k, shape, s):
        return s * jax.random.normal(k, shape, jnp.float32)

    blocks = []
    for i in range(depth):
        key, *ks = jax.random.split(key, 14)
        shift = 0 if i % 2 == 0 else window_size // 2
        blocks.append({
            "window_size": window_size,
            "shift_size": shift,
            "num_heads": num_heads,
            "norm1_w": 1.0 + normal(ks[0], (dim,), 0.05),
            "norm1_b": normal(ks[1], (dim,), 0.05),
            "norm2_w": 1.0 + normal(ks[2], (dim,), 0.05),
            "norm2_b": normal(ks[3], (dim,), 0.05),
            "attn": {
                "rel_bias_table": normal(
                    ks[4], ((2 * window_size - 1) ** 2, num_heads), 0.02),
                "w_qkv": normal(ks[5], (3 * dim, dim), 0.05),
                "b_qkv": normal(ks[6], (3 * dim,), 0.05),
                "w_proj": normal(ks[7], (dim, dim), 0.05),
                "b_proj": normal(ks[8], (dim,), 0.05),
            },
            "mlp": {
                "fc1_w": normal(ks[9], (mlp_hidden, dim), 0.05),
                "fc1_b": normal(ks[10], (mlp_hidden,), 0.05),
                "fc2_w": normal(ks[11], (dim, mlp_hidden), 0.05),
                "fc2_b": normal(ks[12], (dim,), 0.05),
            },
            "attn_mask": (make_shift_mask(input_resolution, window_size, shift)
                          if shift > 0 else None),
        })

    key, kx = jax.random.split(key)
    x = jax.random.normal(kx, (batch, input_resolution, dim), jnp.float32)

    # Hoisted constants: built ONCE, outside the forward path.
    prepared = [prepare_block(blk, input_resolution) for blk in blocks]
    prepared = jax.block_until_ready(prepared)

    # Fused Pallas forward (one pallas_call per block) vs. faithful f32 ref.
    out = basic_layer_pallas(x, prepared)
    out = jax.block_until_ready(out)
    ref = basic_layer_ref(x, blocks)

    assert out.shape == x.shape
    err = jnp.max(jnp.abs(out - ref))
    # Tolerance covers bf16 MXU operands (f32 accumulation) through 2 stacked
    # blocks; measured error is typically ~1e-3.
    assert jnp.allclose(out, ref, atol=5e-3, rtol=5e-3), f"layer max err {err}"

    print("KERNEL_OK")
</pallas_src>

<mosaic_0001>
module attributes {stable_mosaic.version = 11 : i64} {
  func.func @_swin_block_kernel(%arg0: i32, %arg1: memref<1x28x32xf32, #tpu.memory_space<vmem>>, %arg2: memref<4x32xf32, #tpu.memory_space<vmem>>, %arg3: memref<32x96xbf16, #tpu.memory_space<vmem>>, %arg4: memref<1x96xf32, #tpu.memory_space<vmem>>, %arg5: memref<4x28x28xf32, #tpu.memory_space<vmem>>, %arg6: memref<4x8x32xbf16, #tpu.memory_space<vmem>>, %arg7: memref<1x32xf32, #tpu.memory_space<vmem>>, %arg8: memref<32x128xbf16, #tpu.memory_space<vmem>>, %arg9: memref<1x128xf32, #tpu.memory_space<vmem>>, %arg10: memref<128x32xbf16, #tpu.memory_space<vmem>>, %arg11: memref<1x32xf32, #tpu.memory_space<vmem>>, %arg12: memref<1x28x32xf32, #tpu.memory_space<vmem>>) attributes {dimension_semantics = [#tpu.dimension_semantics<parallel>], iteration_bounds = array<i64: 2>, scalar_prefetch = 0 : i64, scratch_operands = 0 : i64, tpu.core_type = #tpu.core_type<tc>, window_params = [{transform_indices = @transform_0, window_bounds = array<i64: 1, 28, 32>}, {pipeline_mode = #tpu.pipeline_mode<synchronous>, transform_indices = @transform_1, window_bounds = array<i64: 4, 32>}, {pipeline_mode = #tpu.pipeline_mode<synchronous>, transform_indices = @transform_2, window_bounds = array<i64: 32, 96>}, {pipeline_mode = #tpu.pipeline_mode<synchronous>, transform_indices = @transform_3, window_bounds = array<i64: 1, 96>}, {pipeline_mode = #tpu.pipeline_mode<synchronous>, transform_indices = @transform_4, window_bounds = array<i64: 4, 28, 28>}, {pipeline_mode = #tpu.pipeline_mode<synchronous>, transform_indices = @transform_5, window_bounds = array<i64: 4, 8, 32>}, {pipeline_mode = #tpu.pipeline_mode<synchronous>, transform_indices = @transform_6, window_bounds = array<i64: 1, 32>}, {pipeline_mode = #tpu.pipeline_mode<synchronous>, transform_indices = @transform_7, window_bounds = array<i64: 32, 128>}, {pipeline_mode = #tpu.pipeline_mode<synchronous>, transform_indices = @transform_8, window_bounds = array<i64: 1, 128>}, {pipeline_mode = #tpu.pipeline_mode<synchronous>, transform_indices = @transform_9, window_bounds = array<i64: 128, 32>}, {pipeline_mode = #tpu.pipeline_mode<synchronous>, transform_indices = @transform_10, window_bounds = array<i64: 1, 32>}, {transform_indices = @transform_11, window_bounds = array<i64: 1, 28, 32>}]} {
    %c0 = arith.constant 0 : index
    %c0_0 = arith.constant 0 : index
    %c0_1 = arith.constant 0 : index
    %0 = vector.load %arg1[%c0, %c0_0, %c0_1] : memref<1x28x32xf32, #tpu.memory_space<vmem>>, vector<1x28x32xf32>
    %1 = vector.shape_cast %0 : vector<1x28x32xf32> to vector<28x32xf32>
    %c0_2 = arith.constant 0 : index
    %c0_3 = arith.constant 0 : index
    %2 = vector.load %arg2[%c0_2, %c0_3] : memref<4x32xf32, #tpu.memory_space<vmem>>, vector<1x32xf32>
    %c1 = arith.constant 1 : index
    %c0_4 = arith.constant 0 : index
    %3 = vector.load %arg2[%c1, %c0_4] : memref<4x32xf32, #tpu.memory_space<vmem>>, vector<1x32xf32>
    %c2 = arith.constant 2 : index
    %c0_5 = arith.constant 0 : index
    %4 = vector.load %arg2[%c2, %c0_5] : memref<4x32xf32, #tpu.memory_space<vmem>>, vector<1x32xf32>
    %c3 = arith.constant 3 : index
    %c0_6 = arith.constant 0 : index
    %5 = vector.load %arg2[%c3, %c0_6] : memref<4x32xf32, #tpu.memory_space<vmem>>, vector<1x32xf32>
    %cst = arith.constant dense<0.000000e+00> : vector<28xf32>
    %6 = vector.multi_reduction <add>, %1, %cst [1] : vector<28x32xf32> to vector<28xf32>
    %7 = vector.shape_cast %6 : vector<28xf32> to vector<28x1xf32>
    %cst_7 = arith.constant 3.200000e+01 : f32
    %8 = vector.broadcast %cst_7 : f32 to vector<28x1xf32>
    %9 = arith.divf %7, %8 : vector<28x1xf32>
    %10 = vector.broadcast %9 : vector<28x1xf32> to vector<28x32xf32>
    %11 = arith.subf %1, %10 : vector<28x32xf32>
    %12 = arith.mulf %11, %11 : vector<28x32xf32>
    %cst_8 = arith.constant dense<0.000000e+00> : vector<28xf32>
    %13 = vector.multi_reduction <add>, %12, %cst_8 [1] : vector<28x32xf32> to vector<28xf32>
    %14 = vector.shape_cast %13 : vector<28xf32> to vector<28x1xf32>
    %cst_9 = arith.constant 3.200000e+01 : f32
    %15 = vector.broadcast %cst_9 : f32 to vector<28x1xf32>
    %16 = arith.divf %14, %15 : vector<28x1xf32>
    %cst_10 = arith.constant 9.99999974E-6 : f32
    %17 = vector.broadcast %cst_10 : f32 to vector<28x1xf32>
    %18 = arith.addf %16, %17 : vector<28x1xf32>
    %19 = math.rsqrt %18 : vector<28x1xf32>
    %20 = vector.broadcast %19 : vector<28x1xf32> to vector<28x32xf32>
    %21 = arith.mulf %11, %20 : vector<28x32xf32>
    %22 = vector.broadcast %2 : vector<1x32xf32> to vector<28x32xf32>
    %23 = arith.mulf %21, %22 : vector<28x32xf32>
    %24 = vector.broadcast %3 : vector<1x32xf32> to vector<28x32xf32>
    %25 = arith.addf %23, %24 : vector<28x32xf32>
    %26 = arith.truncf %25 : vector<28x32xf32> to vector<28x32xbf16>
    %c0_11 = arith.constant 0 : index
    %c0_12 = arith.constant 0 : index
    %27 = vector.load %arg3[%c0_11, %c0_12] : memref<32x96xbf16, #tpu.memory_space<vmem>>, vector<32x96xbf16>
    %cst_13 = arith.constant dense<0.000000e+00> : vector<28x96xf32>
    %28 = tpu.matmul %26, %27, %cst_13 {dimension_numbers = #tpu.dot_dimension_numbers<[1], [0], [0], [1], [0, 0, 1, 1], [], []>} : vector<28x32xbf16>, vector<32x96xbf16>, vector<28x96xf32> -> vector<28x96xf32>
    %c0_14 = arith.constant 0 : index
    %c0_15 = arith.constant 0 : index
    %29 = vector.load %arg4[%c0_14, %c0_15] : memref<1x96xf32, #tpu.memory_space<vmem>>, vector<1x96xf32>
    %30 = vector.broadcast %29 : vector<1x96xf32> to vector<28x96xf32>
    %31 = arith.addf %28, %30 : vector<28x96xf32>
    %cst_16 = arith.constant 0.000000e+00 : f32
    %32 = vector.broadcast %cst_16 : f32 to vector<28x32xf32>
    %33 = vector.extract_strided_slice %31 {offsets = [0, 0], sizes = [28, 8], strides = [1, 1]} : vector<28x96xf32> to vector<28x8xf32>
    %34 = arith.truncf %33 : vector<28x8xf32> to vector<28x8xbf16>
    %35 = vector.extract_strided_slice %31 {offsets = [0, 32], sizes = [28, 8], strides = [1, 1]} : vector<28x96xf32> to vector<28x8xf32>
    %36 = arith.truncf %35 : vector<28x8xf32> to vector<28x8xbf16>
    %37 = vector.extract_strided_slice %31 {offsets = [0, 64], sizes = [28, 8], strides = [1, 1]} : vector<28x96xf32> to vector<28x8xf32>
    %38 = arith.truncf %37 : vector<28x8xf32> to vector<28x8xbf16>
    %cst_17 = arith.constant dense<0.000000e+00> : vector<28x28xf32>
    %39 = tpu.matmul %34, %36, %cst_17 {dimension_numbers = #tpu.dot_dimension_numbers<[1], [1], [0], [0], [0, 0, 1, 0], [], []>} : vector<28x8xbf16>, vector<28x8xbf16>, vector<28x28xf32> -> vector<28x28xf32>
    %c0_18 = arith.constant 0 : index
    %c0_19 = arith.constant 0 : index
    %c0_20 = arith.constant 0 : index
    %40 = vector.load %arg5[%c0_18, %c0_19, %c0_20] : memref<4x28x28xf32, #tpu.memory_space<vmem>>, vector<1x28x28xf32>
    %41 = vector.shape_cast %40 : vector<1x28x28xf32> to vector<28x28xf32>
    %42 = arith.addf %39, %41 : vector<28x28xf32>
    %cst_21 = arith.constant dense<0xFF800000> : vector<28xf32>
    %43 = vector.multi_reduction <maximumf>, %42, %cst_21 [1] : vector<28x28xf32> to vector<28xf32>
    %44 = vector.shape_cast %43 : vector<28xf32> to vector<28x1xf32>
    %45 = vector.broadcast %44 : vector<28x1xf32> to vector<28x28xf32>
    %46 = arith.subf %42, %45 : vector<28x28xf32>
    %47 = math.exp %46 : vector<28x28xf32>
    %cst_22 = arith.constant dense<0.000000e+00> : vector<28xf32>
    %48 = vector.multi_reduction <add>, %47, %cst_22 [1] : vector<28x28xf32> to vector<28xf32>
    %49 = vector.shape_cast %48 : vector<28xf32> to vector<28x1xf32>
    %50 = tpu.reciprocal %49 {approx = true} : vector<28x1xf32> -> vector<28x1xf32>
    %51 = arith.mulf %49, %50 : vector<28x1xf32>
    %cst_23 = arith.constant 2.000000e+00 : f32
    %52 = vector.broadcast %cst_23 : f32 to vector<28x1xf32>
    %53 = arith.subf %52, %51 : vector<28x1xf32>
    %54 = arith.mulf %50, %53 : vector<28x1xf32>
    %55 = vector.broadcast %54 : vector<28x1xf32> to vector<28x28xf32>
    %56 = arith.mulf %47, %55 : vector<28x28xf32>
    %57 = arith.truncf %56 : vector<28x28xf32> to vector<28x28xbf16>
    %cst_24 = arith.constant dense<0.000000e+00> : vector<28x8xf32>
    %58 = tpu.matmul %57, %38, %cst_24 {dimension_numbers = #tpu.dot_dimension_numbers<[1], [0], [0], [1], [0, 0, 1, 1], [], []>} : vector<28x28xbf16>, vector<28x8xbf16>, vector<28x8xf32> -> vector<28x8xf32>
    %59 = arith.truncf %58 : vector<28x8xf32> to vector<28x8xbf16>
    %c0_25 = arith.constant 0 : index
    %c0_26 = arith.constant 0 : index
    %c0_27 = arith.constant 0 : index
    %60 = vector.load %arg6[%c0_25, %c0_26, %c0_27] : memref<4x8x32xbf16, #tpu.memory_space<vmem>>, vector<1x8x32xbf16>
    %61 = vector.shape_cast %60 : vector<1x8x32xbf16> to vector<8x32xbf16>
    %cst_28 = arith.constant dense<0.000000e+00> : vector<28x32xf32>
    %62 = tpu.matmul %59, %61, %cst_28 {dimension_numbers = #tpu.dot_dimension_numbers<[1], [0], [0], [1], [0, 0, 1, 1], [], []>} : vector<28x8xbf16>, vector<8x32xbf16>, vector<28x32xf32> -> vector<28x32xf32>
    %63 = arith.addf %32, %62 : vector<28x32xf32>
    %64 = vector.extract_strided_slice %31 {offsets = [0, 8], sizes = [28, 8], strides = [1, 1]} : vector<28x96xf32> to vector<28x8xf32>
    %65 = arith.truncf %64 : vector<28x8xf32> to vector<28x8xbf16>
    %66 = vector.extract_strided_slice %31 {offsets = [0, 40], sizes = [28, 8], strides = [1, 1]} : vector<28x96xf32> to vector<28x8xf32>
    %67 = arith.truncf %66 : vector<28x8xf32> to vector<28x8xbf16>
    %68 = vector.extract_strided_slice %31 {offsets = [0, 72], sizes = [28, 8], strides = [1, 1]} : vector<28x96xf32> to vector<28x8xf32>
    %69 = arith.truncf %68 : vector<28x8xf32> to vector<28x8xbf16>
    %cst_29 = arith.constant dense<0.000000e+00> : vector<28x28xf32>
    %70 = tpu.matmul %65, %67, %cst_29 {dimension_numbers = #tpu.dot_dimension_numbers<[1], [1], [0], [0], [0, 0, 1, 0], [], []>} : vector<28x8xbf16>, vector<28x8xbf16>, vector<28x28xf32> -> vector<28x28xf32>
    %c1_30 = arith.constant 1 : index
    %c0_31 = arith.constant 0 : index
    %c0_32 = arith.constant 0 : index
    %71 = vector.load %arg5[%c1_30, %c0_31, %c0_32] : memref<4x28x28xf32, #tpu.memory_space<vmem>>, vector<1x28x28xf32>
    %72 = vector.shape_cast %71 : vector<1x28x28xf32> to vector<28x28xf32>
    %73 = arith.addf %70, %72 : vector<28x28xf32>
    %cst_33 = arith.constant dense<0xFF800000> : vector<28xf32>
    %74 = vector.multi_reduction <maximumf>, %73, %cst_33 [1] : vector<28x28xf32> to vector<28xf32>
    %75 = vector.shape_cast %74 : vector<28xf32> to vector<28x1xf32>
    %76 = vector.broadcast %75 : vector<28x1xf32> to vector<28x28xf32>
    %77 = arith.subf %73, %76 : vector<28x28xf32>
    %78 = math.exp %77 : vector<28x28xf32>
    %cst_34 = arith.constant dense<0.000000e+00> : vector<28xf32>
    %79 = vector.multi_reduction <add>, %78, %cst_34 [1] : vector<28x28xf32> to vector<28xf32>
    %80 = vector.shape_cast %79 : vector<28xf32> to vector<28x1xf32>
    %81 = tpu.reciprocal %80 {approx = true} : vector<28x1xf32> -> vector<28x1xf32>
    %82 = arith.mulf %80, %81 : vector<28x1xf32>
    %cst_35 = arith.constant 2.000000e+00 : f32
    %83 = vector.broadcast %cst_35 : f32 to vector<28x1xf32>
    %84 = arith.subf %83, %82 : vector<28x1xf32>
    %85 = arith.mulf %81, %84 : vector<28x1xf32>
    %86 = vector.broadcast %85 : vector<28x1xf32> to vector<28x28xf32>
    %87 = arith.mulf %78, %86 : vector<28x28xf32>
    %88 = arith.truncf %87 : vector<28x28xf32> to vector<28x28xbf16>
    %cst_36 = arith.constant dense<0.000000e+00> : vector<28x8xf32>
    %89 = tpu.matmul %88, %69, %cst_36 {dimension_numbers = #tpu.dot_dimension_numbers<[1], [0], [0], [1], [0, 0, 1, 1], [], []>} : vector<28x28xbf16>, vector<28x8xbf16>, vector<28x8xf32> -> vector<28x8xf32>
    %90 = arith.truncf %89 : vector<28x8xf32> to vector<28x8xbf16>
    %c1_37 = arith.constant 1 : index
    %c0_38 = arith.constant 0 : index
    %c0_39 = arith.constant 0 : index
    %91 = vector.load %arg6[%c1_37, %c0_38, %c0_39] : memref<4x8x32xbf16, #tpu.memory_space<vmem>>, vector<1x8x32xbf16>
    %92 = vector.shape_cast %91 : vector<1x8x32xbf16> to vector<8x32xbf16>
    %cst_40 = arith.constant dense<0.000000e+00> : vector<28x32xf32>
    %93 = tpu.matmul %90, %92, %cst_40 {dimension_numbers = #tpu.dot_dimension_numbers<[1], [0], [0], [1], [0, 0, 1, 1], [], []>} : vector<28x8xbf16>, vector<8x32xbf16>, vector<28x32xf32> -> vector<28x32xf32>
    %94 = arith.addf %63, %93 : vector<28x32xf32>
    %95 = vector.extract_strided_slice %31 {offsets = [0, 16], sizes = [28, 8], strides = [1, 1]} : vector<28x96xf32> to vector<28x8xf32>
    %96 = arith.truncf %95 : vector<28x8xf32> to vector<28x8xbf16>
    %97 = vector.extract_strided_slice %31 {offsets = [0, 48], sizes = [28, 8], strides = [1, 1]} : vector<28x96xf32> to vector<28x8xf32>
    %98 = arith.truncf %97 : vector<28x8xf32> to vector<28x8xbf16>
    %99 = vector.extract_strided_slice %31 {offsets = [0, 80], sizes = [28, 8], strides = [1, 1]} : vector<28x96xf32> to vector<28x8xf32>
    %100 = arith.truncf %99 : vector<28x8xf32> to vector<28x8xbf16>
    %cst_41 = arith.constant dense<0.000000e+00> : vector<28x28xf32>
    %101 = tpu.matmul %96, %98, %cst_41 {dimension_numbers = #tpu.dot_dimension_numbers<[1], [1], [0], [0], [0, 0, 1, 0], [], []>} : vector<28x8xbf16>, vector<28x8xbf16>, vector<28x28xf32> -> vector<28x28xf32>
    %c2_42 = arith.constant 2 : index
    %c0_43 = arith.constant 0 : index
    %c0_44 = arith.constant 0 : index
    %102 = vector.load %arg5[%c2_42, %c0_43, %c0_44] : memref<4x28x28xf32, #tpu.memory_space<vmem>>, vector<1x28x28xf32>
    %103 = vector.shape_cast %102 : vector<1x28x28xf32> to vector<28x28xf32>
    %104 = arith.addf %101, %103 : vector<28x28xf32>
    %cst_45 = arith.constant dense<0xFF800000> : vector<28xf32>
    %105 = vector.multi_reduction <maximumf>, %104, %cst_45 [1] : vector<28x28xf32> to vector<28xf32>
    %106 = vector.shape_cast %105 : vector<28xf32> to vector<28x1xf32>
    %107 = vector.broadcast %106 : vector<28x1xf32> to vector<28x28xf32>
    %108 = arith.subf %104, %107 : vector<28x28xf32>
    %109 = math.exp %108 : vector<28x28xf32>
    %cst_46 = arith.constant dense<0.000000e+00> : vector<28xf32>
    %110 = vector.multi_reduction <add>, %109, %cst_46 [1] : vector<28x28xf32> to vector<28xf32>
    %111 = vector.shape_cast %110 : vector<28xf32> to vector<28x1xf32>
    %112 = tpu.reciprocal %111 {approx = true} : vector<28x1xf32> -> vector<28x1xf32>
    %113 = arith.mulf %111, %112 : vector<28x1xf32>
    %cst_47 = arith.constant 2.000000e+00 : f32
    %114 = vector.broadcast %cst_47 : f32 to vector<28x1xf32>
    %115 = arith.subf %114, %113 : vector<28x1xf32>
    %116 = arith.mulf %112, %115 : vector<28x1xf32>
    %117 = vector.broadcast %116 : vector<28x1xf32> to vector<28x28xf32>
    %118 = arith.mulf %109, %117 : vector<28x28xf32>
    %119 = arith.truncf %118 : vector<28x28xf32> to vector<28x28xbf16>
    %cst_48 = arith.constant dense<0.000000e+00> : vector<28x8xf32>
    %120 = tpu.matmul %119, %100, %cst_48 {dimension_numbers = #tpu.dot_dimension_numbers<[1], [0], [0], [1], [0, 0, 1, 1], [], []>} : vector<28x28xbf16>, vector<28x8xbf16>, vector<28x8xf32> -> vector<28x8xf32>
    %121 = arith.truncf %120 : vector<28x8xf32> to vector<28x8xbf16>
    %c2_49 = arith.constant 2 : index
    %c0_50 = arith.constant 0 : index
    %c0_51 = arith.constant 0 : index
    %122 = vector.load %arg6[%c2_49, %c0_50, %c0_51] : memref<4x8x32xbf16, #tpu.memory_space<vmem>>, vector<1x8x32xbf16>
    %123 = vector.shape_cast %122 : vector<1x8x32xbf16> to vector<8x32xbf16>
    %cst_52 = arith.constant dense<0.000000e+00> : vector<28x32xf32>
    %124 = tpu.matmul %121, %123, %cst_52 {dimension_numbers = #tpu.dot_dimension_numbers<[1], [0], [0], [1], [0, 0, 1, 1], [], []>} : vector<28x8xbf16>, vector<8x32xbf16>, vector<28x32xf32> -> vector<28x32xf32>
    %125 = arith.addf %94, %124 : vector<28x32xf32>
    %126 = vector.extract_strided_slice %31 {offsets = [0, 24], sizes = [28, 8], strides = [1, 1]} : vector<28x96xf32> to vector<28x8xf32>
    %127 = arith.truncf %126 : vector<28x8xf32> to vector<28x8xbf16>
    %128 = vector.extract_strided_slice %31 {offsets = [0, 56], sizes = [28, 8], strides = [1, 1]} : vector<28x96xf32> to vector<28x8xf32>
    %129 = arith.truncf %128 : vector<28x8xf32> to vector<28x8xbf16>
    %130 = vector.extract_strided_slice %31 {offsets = [0, 88], sizes = [28, 8], strides = [1, 1]} : vector<28x96xf32> to vector<28x8xf32>
    %131 = arith.truncf %130 : vector<28x8xf32> to vector<28x8xbf16>
    %cst_53 = arith.constant dense<0.000000e+00> : vector<28x28xf32>
    %132 = tpu.matmul %127, %129, %cst_53 {dimension_numbers = #tpu.dot_dimension_numbers<[1], [1], [0], [0], [0, 0, 1, 0], [], []>} : vector<28x8xbf16>, vector<28x8xbf16>, vector<28x28xf32> -> vector<28x28xf32>
    %c3_54 = arith.constant 3 : index
    %c0_55 = arith.constant 0 : index
    %c0_56 = arith.constant 0 : index
    %133 = vector.load %arg5[%c3_54, %c0_55, %c0_56] : memref<4x28x28xf32, #tpu.memory_space<vmem>>, vector<1x28x28xf32>
    %134 = vector.shape_cast %133 : vector<1x28x28xf32> to vector<28x28xf32>
    %135 = arith.addf %132, %134 : vector<28x28xf32>
    %cst_57 = arith.constant dense<0xFF800000> : vector<28xf32>
    %136 = vector.multi_reduction <maximumf>, %135, %cst_57 [1] : vector<28x28xf32> to vector<28xf32>
    %137 = vector.shape_cast %136 : vector<28xf32> to vector<28x1xf32>
    %138 = vector.broadcast %137 : vector<28x1xf32> to vector<28x28xf32>
    %139 = arith.subf %135, %138 : vector<28x28xf32>
    %140 = math.exp %139 : vector<28x28xf32>
    %cst_58 = arith.constant dense<0.000000e+00> : vector<28xf32>
    %141 = vector.multi_reduction <add>, %140, %cst_58 [1] : vector<28x28xf32> to vector<28xf32>
    %142 = vector.shape_cast %141 : vector<28xf32> to vector<28x1xf32>
    %143 = tpu.reciprocal %142 {approx = true} : vector<28x1xf32> -> vector<28x1xf32>
    %144 = arith.mulf %142, %143 : vector<28x1xf32>
    %cst_59 = arith.constant 2.000000e+00 : f32
    %145 = vector.broadcast %cst_59 : f32 to vector<28x1xf32>
    %146 = arith.subf %145, %144 : vector<28x1xf32>
    %147 = arith.mulf %143, %146 : vector<28x1xf32>
    %148 = vector.broadcast %147 : vector<28x1xf32> to vector<28x28xf32>
    %149 = arith.mulf %140, %148 : vector<28x28xf32>
    %150 = arith.truncf %149 : vector<28x28xf32> to vector<28x28xbf16>
    %cst_60 = arith.constant dense<0.000000e+00> : vector<28x8xf32>
    %151 = tpu.matmul %150, %131, %cst_60 {dimension_numbers = #tpu.dot_dimension_numbers<[1], [0], [0], [1], [0, 0, 1, 1], [], []>} : vector<28x28xbf16>, vector<28x8xbf16>, vector<28x8xf32> -> vector<28x8xf32>
    %152 = arith.truncf %151 : vector<28x8xf32> to vector<28x8xbf16>
    %c3_61 = arith.constant 3 : index
    %c0_62 = arith.constant 0 : index
    %c0_63 = arith.constant 0 : index
    %153 = vector.load %arg6[%c3_61, %c0_62, %c0_63] : memref<4x8x32xbf16, #tpu.memory_space<vmem>>, vector<1x8x32xbf16>
    %154 = vector.shape_cast %153 : vector<1x8x32xbf16> to vector<8x32xbf16>
    %cst_64 = arith.constant dense<0.000000e+00> : vector<28x32xf32>
    %155 = tpu.matmul %152, %154, %cst_64 {dimension_numbers = #tpu.dot_dimension_numbers<[1], [0], [0], [1], [0, 0, 1, 1], [], []>} : vector<28x8xbf16>, vector<8x32xbf16>, vector<28x32xf32> -> vector<28x32xf32>
    %156 = arith.addf %125, %155 : vector<28x32xf32>
    %157 = arith.addf %1, %156 : vector<28x32xf32>
    %c0_65 = arith.constant 0 : index
    %c0_66 = arith.constant 0 : index
    %158 = vector.load %arg7[%c0_65, %c0_66] : memref<1x32xf32, #tpu.memory_space<vmem>>, vector<1x32xf32>
    %159 = vector.broadcast %158 : vector<1x32xf32> to vector<28x32xf32>
    %160 = arith.addf %157, %159 : vector<28x32xf32>
    %cst_67 = arith.constant dense<0.000000e+00> : vector<28xf32>
    %161 = vector.multi_reduction <add>, %160, %cst_67 [1] : vector<28x32xf32> to vector<28xf32>
    %162 = vector.shape_cast %161 : vector<28xf32> to vector<28x1xf32>
    %cst_68 = arith.constant 3.200000e+01 : f32
    %163 = vector.broadcast %cst_68 : f32 to vector<28x1xf32>
    %164 = arith.divf %162, %163 : vector<28x1xf32>
    %165 = vector.broadcast %164 : vector<28x1xf32> to vector<28x32xf32>
    %166 = arith.subf %160, %165 : vector<28x32xf32>
    %167 = arith.mulf %166, %166 : vector<28x32xf32>
    %cst_69 = arith.constant dense<0.000000e+00> : vector<28xf32>
    %168 = vector.multi_reduction <add>, %167, %cst_69 [1] : vector<28x32xf32> to vector<28xf32>
    %169 = vector.shape_cast %168 : vector<28xf32> to vector<28x1xf32>
    %cst_70 = arith.constant 3.200000e+01 : f32
    %170 = vector.broadcast %cst_70 : f32 to vector<28x1xf32>
    %171 = arith.divf %169, %170 : vector<28x1xf32>
    %cst_71 = arith.constant 9.99999974E-6 : f32
    %172 = vector.broadcast %cst_71 : f32 to vector<28x1xf32>
    %173 = arith.addf %171, %172 : vector<28x1xf32>
    %174 = math.rsqrt %173 : vector<28x1xf32>
    %175 = vector.broadcast %174 : vector<28x1xf32> to vector<28x32xf32>
    %176 = arith.mulf %166, %175 : vector<28x32xf32>
    %177 = vector.broadcast %4 : vector<1x32xf32> to vector<28x32xf32>
    %178 = arith.mulf %176, %177 : vector<28x32xf32>
    %179 = vector.broadcast %5 : vector<1x32xf32> to vector<28x32xf32>
    %180 = arith.addf %178, %179 : vector<28x32xf32>
    %181 = arith.truncf %180 : vector<28x32xf32> to vector<28x32xbf16>
    %c0_72 = arith.constant 0 : index
    %c0_73 = arith.constant 0 : index
    %182 = vector.load %arg8[%c0_72, %c0_73] : memref<32x128xbf16, #tpu.memory_space<vmem>>, vector<32x128xbf16>
    %cst_74 = arith.constant dense<0.000000e+00> : vector<28x128xf32>
    %183 = tpu.matmul %181, %182, %cst_74 {dimension_numbers = #tpu.dot_dimension_numbers<[1], [0], [0], [1], [0, 0, 1, 1], [], []>} : vector<28x32xbf16>, vector<32x128xbf16>, vector<28x128xf32> -> vector<28x128xf32>
    %c0_75 = arith.constant 0 : index
    %c0_76 = arith.constant 0 : index
    %184 = vector.load %arg9[%c0_75, %c0_76] : memref<1x128xf32, #tpu.memory_space<vmem>>, vector<1x128xf32>
    %185 = vector.broadcast %184 : vector<1x128xf32> to vector<28x128xf32>
    %186 = arith.addf %183, %185 : vector<28x128xf32>
    %cst_77 = arith.constant 5.000000e-01 : f32
    %187 = vector.broadcast %cst_77 : f32 to vector<28x128xf32>
    %188 = arith.mulf %187, %186 : vector<28x128xf32>
    %cst_78 = arith.constant 0.707106769 : f32
    %189 = vector.broadcast %cst_78 : f32 to vector<28x128xf32>
    %190 = arith.mulf %186, %189 : vector<28x128xf32>
    %191 = math.absf %190 : vector<28x128xf32>
    %cst_79 = arith.constant 0.327591091 : f32
    %192 = vector.broadcast %cst_79 : f32 to vector<28x128xf32>
    %193 = arith.mulf %192, %191 : vector<28x128xf32>
    %cst_80 = arith.constant 1.000000e+00 : f32
    %194 = vector.broadcast %cst_80 : f32 to vector<28x128xf32>
    %195 = arith.addf %194, %193 : vector<28x128xf32>
    %cst_81 = arith.constant 1.000000e+00 : f32
    %196 = vector.broadcast %cst_81 : f32 to vector<28x128xf32>
    %197 = arith.divf %196, %195 : vector<28x128xf32>
    %cst_82 = arith.constant 1.06140542 : f32
    %198 = vector.broadcast %cst_82 : f32 to vector<28x128xf32>
    %199 = arith.mulf %197, %198 : vector<28x128xf32>
    %cst_83 = arith.constant -1.45315206 : f32
    %200 = vector.broadcast %cst_83 : f32 to vector<28x128xf32>
    %201 = arith.addf %200, %199 : vector<28x128xf32>
    %202 = arith.mulf %197, %201 : vector<28x128xf32>
    %cst_84 = arith.constant 1.42141378 : f32
    %203 = vector.broadcast %cst_84 : f32 to vector<28x128xf32>
    %204 = arith.addf %203, %202 : vector<28x128xf32>
    %205 = arith.mulf %197, %204 : vector<28x128xf32>
    %cst_85 = arith.constant -0.284496725 : f32
    %206 = vector.broadcast %cst_85 : f32 to vector<28x128xf32>
    %207 = arith.addf %206, %205 : vector<28x128xf32>
    %208 = arith.mulf %197, %207 : vector<28x128xf32>
    %cst_86 = arith.constant 0.254829586 : f32
    %209 = vector.broadcast %cst_86 : f32 to vector<28x128xf32>
    %210 = arith.addf %209, %208 : vector<28x128xf32>
    %211 = arith.mulf %197, %210 : vector<28x128xf32>
    %cst_87 = arith.constant 0.000000e+00 : f32
    %212 = vector.broadcast %cst_87 : f32 to vector<28x128xf32>
    %213 = arith.subf %212, %191 : vector<28x128xf32>
    %214 = arith.mulf %213, %191 : vector<28x128xf32>
    %215 = math.exp %214 : vector<28x128xf32>
    %216 = arith.mulf %211, %215 : vector<28x128xf32>
    %cst_88 = arith.constant 1.000000e+00 : f32
    %217 = vector.broadcast %cst_88 : f32 to vector<28x128xf32>
    %218 = arith.subf %217, %216 : vector<28x128xf32>
    %cst_89 = arith.constant 0.000000e+00 : f32
    %219 = vector.broadcast %cst_89 : f32 to vector<28x128xf32>
    %220 = arith.cmpf oge, %190, %219 : vector<28x128xf32>
    %cst_90 = arith.constant 0.000000e+00 : f32
    %221 = vector.broadcast %cst_90 : f32 to vector<28x128xf32>
    %222 = arith.subf %221, %218 : vector<28x128xf32>
    %223 = arith.select %220, %218, %222 : vector<28x128xi1>, vector<28x128xf32>
    %cst_91 = arith.constant 1.000000e+00 : f32
    %224 = vector.broadcast %cst_91 : f32 to vector<28x128xf32>
    %225 = arith.addf %224, %223 : vector<28x128xf32>
    %226 = arith.mulf %188, %225 : vector<28x128xf32>
    %227 = arith.truncf %226 : vector<28x128xf32> to vector<28x128xbf16>
    %c0_92 = arith.constant 0 : index
    %c0_93 = arith.constant 0 : index
    %228 = vector.load %arg10[%c0_92, %c0_93] : memref<128x32xbf16, #tpu.memory_space<vmem>>, vector<128x32xbf16>
    %cst_94 = arith.constant dense<0.000000e+00> : vector<28x32xf32>
    %229 = tpu.matmul %227, %228, %cst_94 {dimension_numbers = #tpu.dot_dimension_numbers<[1], [0], [0], [1], [0, 0, 1, 1], [], []>} : vector<28x128xbf16>, vector<128x32xbf16>, vector<28x32xf32> -> vector<28x32xf32>
    %c0_95 = arith.constant 0 : index
    %c0_96 = arith.constant 0 : index
    %230 = vector.load %arg11[%c0_95, %c0_96] : memref<1x32xf32, #tpu.memory_space<vmem>>, vector<1x32xf32>
    %231 = vector.broadcast %230 : vector<1x32xf32> to vector<28x32xf32>
    %232 = arith.addf %229, %231 : vector<28x32xf32>
    %233 = arith.addf %160, %232 : vector<28x32xf32>
    %c0_97 = arith.constant 0 : index
    %c0_98 = arith.constant 0 : index
    %c0_99 = arith.constant 0 : index
    %234 = vector.load %arg12[%c0_97, %c0_98, %c0_99] : memref<1x28x32xf32, #tpu.memory_space<vmem>>, vector<1x28x32xf32>
    %235 = vector.shape_cast %234 : vector<1x28x32xf32> to vector<28x32xf32>
    %236 = vector.shape_cast %233 : vector<28x32xf32> to vector<1x28x32xf32>
    tpu.vector_store %arg12[%c0_97, %c0_98, %c0_99], %236 {strides = array<i32>} : memref<1x28x32xf32, #tpu.memory_space<vmem>>, vector<1x28x32xf32>,
    return
  }
  func.func @transform_0(%arg0: i32) -> (i32, i32, i32) {
    %c0_i32 = arith.constant 0 : i32
    %c0_i32_0 = arith.constant 0 : i32
    %c0_i32_1 = arith.constant 0 : i32
    return %arg0, %c0_i32, %c0_i32_0 : i32, i32, i32
  }
  func.func @transform_1(%arg0: i32) -> (i32, i32) {
    %c0_i32 = arith.constant 0 : i32
    %c0_i32_0 = arith.constant 0 : i32
    %c0_i32_1 = arith.constant 0 : i32
    return %c0_i32, %c0_i32_0 : i32, i32
  }
  func.func @transform_2(%arg0: i32) -> (i32, i32) {
    %c0_i32 = arith.constant 0 : i32
    %c0_i32_0 = arith.constant 0 : i32
    %c0_i32_1 = arith.constant 0 : i32
    return %c0_i32, %c0_i32_0 : i32, i32
  }
  func.func @transform_3(%arg0: i32) -> (i32, i32) {
    %c0_i32 = arith.constant 0 : i32
    %c0_i32_0 = arith.constant 0 : i32
    %c0_i32_1 = arith.constant 0 : i32
    return %c0_i32, %c0_i32_0 : i32, i32
  }
  func.func @transform_4(%arg0: i32) -> (i32, i32, i32) {
    %c0_i32 = arith.constant 0 : i32
    %c0_i32_0 = arith.constant 0 : i32
    %c0_i32_1 = arith.constant 0 : i32
    %c0_i32_2 = arith.constant 0 : i32
    return %c0_i32, %c0_i32_0, %c0_i32_1 : i32, i32, i32
  }
  func.func @transform_5(%arg0: i32) -> (i32, i32, i32) {
    %c0_i32 = arith.constant 0 : i32
    %c0_i32_0 = arith.constant 0 : i32
    %c0_i32_1 = arith.constant 0 : i32
    %c0_i32_2 = arith.constant 0 : i32
    return %c0_i32, %c0_i32_0, %c0_i32_1 : i32, i32, i32
  }
  func.func @transform_6(%arg0: i32) -> (i32, i32) {
    %c0_i32 = arith.constant 0 : i32
    %c0_i32_0 = arith.constant 0 : i32
    %c0_i32_1 = arith.constant 0 : i32
    return %c0_i32, %c0_i32_0 : i32, i32
  }
  func.func @transform_7(%arg0: i32) -> (i32, i32) {
    %c0_i32 = arith.constant 0 : i32
    %c0_i32_0 = arith.constant 0 : i32
    %c0_i32_1 = arith.constant 0 : i32
    return %c0_i32, %c0_i32_0 : i32, i32
  }
  func.func @transform_8(%arg0: i32) -> (i32, i32) {
    %c0_i32 = arith.constant 0 : i32
    %c0_i32_0 = arith.constant 0 : i32
    %c0_i32_1 = arith.constant 0 : i32
    return %c0_i32, %c0_i32_0 : i32, i32
  }
  func.func @transform_9(%arg0: i32) -> (i32, i32) {
    %c0_i32 = arith.constant 0 : i32
    %c0_i32_0 = arith.constant 0 : i32
    %c0_i32_1 = arith.constant 0 : i32
    return %c0_i32, %c0_i32_0 : i32, i32
  }
  func.func @transform_10(%arg0: i32) -> (i32, i32) {
    %c0_i32 = arith.constant 0 : i32
    %c0_i32_0 = arith.constant 0 : i32
    %c0_i32_1 = arith.constant 0 : i32
    return %c0_i32, %c0_i32_0 : i32, i32
  }
  func.func @transform_11(%arg0: i32) -> (i32, i32, i32) {
    %c0_i32 = arith.constant 0 : i32
    %c0_i32_0 = arith.constant 0 : i32
    %c0_i32_1 = arith.constant 0 : i32
    return %arg0, %c0_i32, %c0_i32_0 : i32, i32, i32
  }
}

</mosaic_0001>

<bundles_post_ra>
// kernel: tpu_custom_call.1
= control target key start
LH: loop header
LB: loop body
LE: loop exit
PB: predicated region body
PF: predicated region fallthrough
CT: control target
= control target key end

     0   :  { %s2542_s17 = smov 0   ;;  %s2968_s0 = inlined_call_operand.vmem [shape: f32[2,28,32], index: 0, kind: input, shape index: {}]   ;;  %s2969_s1 = inlined_call_operand.vmem [shape: f32[4,32], index: 1, kind: input, shape index: {}]   ;;  %s2970_s2 = inlined_call_operand.vmem [shape: bf16[32,96], index: 2, kind: input, shape index: {}]   ;;  %s2971_s3 = inlined_call_operand.vmem [shape: f32[1,96], index: 3, kind: input, shape index: {}]   ;;  %s2972_s4 = inlined_call_operand.vmem [shape: f32[4,28,28], index: 4, kind: input, shape index: {}]   ;;  %s2973_s5 = inlined_call_operand.vmem [shape: bf16[4,8,32], index: 5, kind: input, shape index: {}]   ;;  %s2974_s6 = inlined_call_operand.vmem [shape: f32[1,32], index: 6, kind: input, shape index: {}]   ;;  %s2975_s7 = inlined_call_operand.vmem [shape: bf16[32,128], index: 7, kind: input, shape index: {}]   ;;  %s2976_s8 = inlined_call_operand.vmem [shape: f32[1,128], index: 8, kind: input, shape index: {}]   ;;  %s2977_s9 = inlined_call_operand.vmem [shape: bf16[128,32], index: 9, kind: input, shape index: {}]   ;;  %s2978_s10 = inlined_call_operand.vmem [shape: f32[1,32], index: 10, kind: input, shape index: {}]   ;;  %s2979_s11 = inlined_call_operand.vmem [shape: f32[2,28,32], index: 11, kind: output, shape index: {}]  }
   0x1 LB: > { %s2042_s18 = sadd.s32 4294967295, %s2469_s17   ;;  %p2046_p0 = scmp.ge.s32.totalorder %s2469_s17, 1  ;;  %s2469_s17 = sphi %s2542_s17, %s21_s17  }
   0x2   : > { %p337_p1 = scmp.lt.s32.totalorder %s2469_s17, 3 }
   0x4   : > { %p338_p2 = pnand %p2046_p0, %p337_p1 }
   0x5   : > { %p377_p3 = scmp.lt.s32.totalorder (!%p338_p2), %s2042_s18, 1  ;;  %vm396_vm0 = vcmask (!%p338_p2), 261120   ;;  %vm406_vm1 = vcmask (!%p338_p2), 257024   ;;  %v2351_v28 = vld [vmem:[%s2970_s2] sm:$0xff] (!%p338_p2)   ;;  %v2352_v29 = vld [vmem:[%s2970_s2 + $0x8] sm:$0xff] (!%p338_p2)   ;;  %vm559_vm2 = vcmask (!%p338_p2), 64512  }
   0x6   : > { %341 = sbr.rel (%p338_p2) target bundleno = 3277 (0xccd), region = 64  ;;  %2180 = vmatprep.subr.bf16.mxu0 (!%p338_p2), %v2351_v28  ;;  %v2051_v44 = vld [vmem:[%s2969_s1] ss:$0 sm:$0xff] (!%p338_p2)  ;;  %v2052_v50 = vld [vmem:[%s2969_s1 + $0x1] ss:$0 sm:$0xff] (!%p338_p2)  ;;  %s2471_s14 = smov (!%p338_p2), 96  }
   0x7   : > { %2181 = vmatpush3.bf16.msra.mxu0 (!%p338_p2), %v2351_v28  ;;  %v2053_v63 = vld [vmem:[%s2971_s3] ss:$0 sm:$0xff] (!%p338_p2)  ;;  %s2472_s15 = smov (!%p338_p2), 88   ;;  %s2473_s16 = smov (!%p338_p2), 120   ;;  %vm621_vm3 = vcmask (!%p338_p2), 228352   ;;  %vm631_vm4 = vcmask (!%p338_p2), 224256  }
   0x8   : > { %2182 = vmatprep.subr.bf16.mxu0 (!%p338_p2), %v2352_v29  ;;  %s2474_s29 = smov (!%p338_p2), 64   ;;  %s2475_s30 = smov (!%p338_p2), 80   ;;  %vm692_vm5 = vcmask (!%p338_p2), 1045504   ;;  %vm953_vm6 = vcmask (!%p338_p2), 1043456  }
   0x9   : > { %s2476_s12 = smov (!%p338_p2), 112   ;;  %s2477_s25 = smov (!%p338_p2), 56  }
   0xa   : > { %s2478_s26 = smov (!%p338_p2), 72   ;;  %s2479_s27 = smov (!%p338_p2), 104  }
   0xb   : > { %2183 = vmatpush3.bf16.msra.mxu0 (!%p338_p2), %v2352_v29  ;;  %s2481_s20 = smov (!%p338_p2), 40  }
   0xd   : > { %s2981_s18 = smov (!%p377_p3, %s2042_s18), 1 }
   0xe   : > { %s2116_s19 = sshll.u32 %s2981_s18, 5 }
   0xf   : > { %s2558_s22 = scalar_lea.vmem %s2968_s0, %s2116_s19  ;;  %s386_s24 = scalar_lea.vmem %s2979_s11, %s2116_s19 }
  0x10   : > { %v388_v0 = vld [vmem:[%s2558_s22] sm:$0xff]  ;;  %v390_v1 = vld [vmem:[%s2558_s22 + $0x10] sm:$0xff]  ;;  %v389_v2 = vld [vmem:[%s2558_s22 + $0x8] sm:$0xff] }
  0x11   : > { %v397_v3 = vsel %vm396_vm0, %v388_v0, 0.0  ;;  %v403_v4 = vsel %vm396_vm0, %v390_v1, 0.0  ;;  %v391_v5 = vld [vmem:[%s2558_s22 + $0x18] sm:$0xf]  ;;  %v400_v6 = vsel %vm396_vm0, %v389_v2, 0.0 }
  0x12   : > { %398 = vadd.xlane.f32.xlu0 %v397_v3  ;;  %404 = vadd.xlane.f32.xlu1 %v403_v4  ;;  %v407_v7 = vsel %vm406_vm1, %v391_v5, 0.0 }
  0x16   : > { %401 = vadd.xlane.f32.xlu0 %v400_v6  ;;  %408 = vadd.xlane.f32.xlu1 %v407_v7 }
  0x9f   : > { %v399_v8 = vpop.xlane.xlu0 %398  ;;  %v405_v9 = vpop.xlane.xlu1 %404 }
  0xa0   : > { %v411_v10 = vmul.f32 0.03125, %v399_v8  ;;  %v413_v11 = vmul.f32 0.03125, %v405_v9 }
  0xa2   : > { %v415_v12 = vsub.f32 %v388_v0, %v411_v10  ;;  %v417_v13 = vsub.f32 %v390_v1, %v413_v11 }
  0xa3   : > { %v402_v14 = vpop.xlane.xlu0 %401  ;;  %v409_v15 = vpop.xlane.xlu1 %408 }
  0xa4   : > { %v412_v16 = vmul.f32 0.03125, %v402_v14  ;;  %v414_v17 = vmul.f32 0.03125, %v409_v15  ;;  %v419_v18 = vmul.f32 %v415_v12, %v415_v12  ;;  %v421_v19 = vmul.f32 %v417_v13, %v417_v13 }
  0xa6   : > { %v416_v20 = vsub.f32 %v389_v2, %v412_v16  ;;  %v418_v21 = vsub.f32 %v391_v5, %v414_v17  ;;  %v423_v22 = vsel %vm396_vm0, %v419_v18, 0.0  ;;  %v429_v23 = vsel %vm396_vm0, %v421_v19, 0.0  ;;  %v549_v19 = vld [vmem:[%s2972_s4] sm:$0xff] }
  0xa7   : > { %424 = vadd.xlane.f32.xlu0 %v423_v22 }
  0xa8   : > { %v420_v24 = vmul.f32 %v416_v20, %v416_v20  ;;  %v422_v25 = vmul.f32 %v418_v21, %v418_v21 }
  0xaa   : > { %v426_v26 = vsel %vm396_vm0, %v420_v24, 0.0  ;;  %v432_v27 = vsel %vm406_vm1, %v422_v25, 0.0 }
  0xab   : > { %430 = vadd.xlane.f32.xlu0 %v429_v23  ;;  %427 = vadd.xlane.f32.xlu1 %v426_v26  ;;  %v550_v23 = vld [vmem:[%s2972_s4 + $0x8] sm:$0xff] }
  0xaf   : > { %433 = vadd.xlane.f32.xlu1 %v432_v27 }
 0x134   : > { %v425_v30 = vpop.xlane.xlu0 %424 }
 0x135   : > { %v435_v31 = vmul.f32 0.03125, %v425_v30  ;;  %v552_v30 = vld [vmem:[%s2972_s4 + $0x18] sm:$0xf] }
 0x137   : > { %v439_v32 = vadd.f32 1e-05, %v435_v31 }
 0x138   : > { %v428_v33 = vpop.xlane.xlu1 %427  ;;  %v431_v34 = vpop.xlane.xlu0 %430 }
 0x139   : > { %2363 = vrsqrt.f32 %v439_v32  ;;  %v436_v35 = vmul.f32 0.03125, %v428_v33  ;;  %v437_v36 = vmul.f32 0.03125, %v431_v34 }
 0x13b   : > { %v440_v37 = vadd.f32 1e-05, %v436_v35  ;;  %v441_v38 = vadd.f32 1e-05, %v437_v36 }
 0x13c   : > { %v434_v39 = vpop.xlane.xlu1 %433 }
 0x13d   : > { %2365 = vrsqrt.f32 %v440_v37  ;;  %v438_v40 = vmul.f32 0.03125, %v434_v39 }
 0x13e   : > { %2367 = vrsqrt.f32 %v441_v38 }
 0x13f   : > { %v442_v41 = vadd.f32 1e-05, %v438_v40 }
 0x141   : > { %2369 = vrsqrt.f32 %v442_v41 }
 0x143   : > { %v2364_v42 = vpop.eup %2363 }
 0x144   : > { %v447_v43 = vmul.f32 %v2364_v42, %v415_v12 }
 0x146   : > { %v455_v48 = vmul.f32 %v2051_v44, %v447_v43 }
 0x147   : > { %v2366_v45 = vpop.eup %2365 }
 0x148   : > { %v2368_v46 = vpop.eup %2367  ;;  %v448_v47 = vmul.f32 %v2366_v45, %v416_v20  ;;  %v463_v54 = vadd.f32 %v2052_v50, %v455_v48 }
 0x149   : > { %v449_v49 = vmul.f32 %v2368_v46, %v417_v13 }
 0x14a   : > { %v456_v51 = vmul.f32 %v2051_v44, %v448_v47 }
 0x14b   : > { %v2370_v52 = vpop.eup %2369  ;;  %v457_v56 = vmul.f32 %v2051_v44, %v449_v49 }
 0x14c   : > { %v450_v53 = vmul.f32 %v2370_v52, %v418_v21  ;;  %v464_v55 = vadd.f32 %v2052_v50, %v456_v51  ;;  %v551_v21 = vld [vmem:[%s2972_s4 + $0x10] sm:$0xff] }
 0x14d   : > { %v465_v59 = vadd.f32 %v2052_v50, %v457_v56 }
 0x14e   : > { %v467_v57 = vpack.c.bf16 %v464_v55, %v463_v54  ;;  %v458_v58 = vmul.f32 %v2051_v44, %v450_v53 }
 0x150   : > { %2184 = vmatprep.mubr.msk.bf16.mxu0 %vm396_vm0, %v467_v57  ;;  %v466_v60 = vadd.f32 %v2052_v50, %v458_v58 }
 0x152   : > { %v468_v61 = vpack.c.bf16 %v466_v60, %v465_v59  ;;  %v2062_v59 = vld [vmem:[%s2972_s4 + $0x20] sm:$0xff] }
 0x154   : > { %2185 = vmatmul.mubr.msk.bf16.vlgmr.msra.gmra.mrb[0].mxu0 %vm396_vm0, %v468_v61  ;;  %v2064_v61 = vld [vmem:[%s2972_s4 + $0x30] sm:$0xff] }
 0x227   : > { %v2186_v62 = vpop.f32.mrb[0].mxu0 }
 0x228   : > { %v532_v0 = vpop.f32.mrb[1].mxu0  ;;  %v541_v2 = vadd.f32 %v2186_v62, %v2053_v63 }
 0x229   : > { %v2187_v1 = vpop.f32.mrb[2].mxu0  ;;  %v533_v5 = vadd.f32 %v2053_v63, %v532_v0  ;;  %v2065_v0 = vld [vmem:[%s2972_s4 + $0x38] sm:$0xf] }
 0x22a   : > { %v544_v3 = vadd.f32 %v2187_v1, %v2053_v63  ;;  %v535_v4 = vpop.f32.mrb[3].mxu0  ;;  %v2063_v1 = vld [vmem:[%s2972_s4 + $0x28] sm:$0xff] }
 0x22b   : > { %v536_v6 = vadd.f32 %v2053_v63, %v535_v4 }
 0x22c   : > { %v2589_v7 = vpack.c.bf16 %v544_v3, %v541_v2 }
 0x22d   : > { %v2591_v8 = vpack.c.bf16 %v536_v6, %v533_v5 }
 0x22e   : > { %557 = vrot.lane.b32.xlu1 %v2589_v7, %s2471_s14 }
 0x22f   : > { %555 = vrot.lane.b32.xlu0 %v2591_v8, %s2471_s14  ;;  %2192 = vmatprep.mubr.msk.bf16.mxu1 %vm559_vm2, %v2591_v8 }
 0x232   : > { %757 = vrot.lane.b32.xlu1 %v2591_v8, %s2472_s15 }
 0x233   : > { %753 = vrot.lane.b32.xlu0 %v2591_v8, %s2473_s16 }
 0x236   : > { %759 = vrot.lane.b32.xlu1 %v2589_v7, %s2472_s15 }
 0x23a   : > { %755 = vrot.lane.b32.xlu1 %v2589_v7, %s2473_s16 }
 0x2a0   : > { %v558_v11 = vpop.permute.xlu1 %557 }
 0x2a1   : > { %v556_v9 = vpop.permute.xlu0 %555  ;;  %v570_v12 = vsel %vm559_vm2, %v558_v11, 0 }
 0x2a2   : > { %2316 = vmatprep.subr.msk.bf16.mxu1 %vm559_vm2, %v556_v9  ;;  %v567_v10 = vsel %vm559_vm2, %v556_v9, 0 }
 0x2a3   : > { %2189 = vmatpush3.bf16.xpose.msra.mxu1 %v567_v10 }
 0x2a4   : > { %2317 = vmatprep.subr.msk.bf16.mxu1 %vm559_vm2, %v558_v11  ;;  %v758_v13 = vpop.permute.xlu1 %757 }
 0x2a5   : > { %v768_v14 = vsel %vm559_vm2, %v758_v13, 0  ;;  %v754_v15 = vpop.permute.xlu0 %753 }
 0x2a8   : > { %v760_v16 = vpop.permute.xlu1 %759 }
 0x2a9   : > { %v771_v17 = vsel %vm559_vm2, %v760_v16, 0 }
 0x2ab   : > { %2191 = vmatpush3.bf16.xpose.msra.mxu1 %v570_v12 }
 0x2ac   : > { %2319 = vmatprep.subr.msk.bf16.mxu1 %vm559_vm2, %v758_v13  ;;  %v756_v18 = vpop.permute.xlu1 %755 }
 0x2b2   : > { %2193 = vmatmul.mubr.msk.bf16.vlgmr.msra.gmra.mrb[0].mxu1 %vm559_vm2, %v2589_v7 }
 0x2b3   : > { %2205 = vmatpush3.bf16.xpose.msra.mxu1 %v768_v14  ;;  %2208 = vmatprep.mubr.msk.bf16.mxu1 %vm559_vm2, %v754_v15 }
 0x2b4   : > { %2320 = vmatprep.subr.msk.bf16.mxu1 %vm559_vm2, %v760_v16 }
 0x2bb   : > { %2207 = vmatpush3.bf16.xpose.msra.mxu1 %v771_v17 }
 0x2c2   : > { %2209 = vmatmul.mubr.msk.bf16.vlgmr.msra.gmra.mrb[4].mxu1 %vm559_vm2, %v756_v18 }
 0x385   : > { %v2194_v20 = vpop.f32.mrb[0].mxu1 }
 0x386   : > { %v606_v22 = vpop.f32.mrb[1].mxu1  ;;  %v615_v27 = vadd.f32 %v2194_v20, %v551_v21 }
 0x387   : > { %v607_v24 = vadd.f32 %v606_v22, %v549_v19  ;;  %v2195_v25 = vpop.f32.mrb[2].mxu1 }
 0x388   : > { %v609_v26 = vpop.f32.mrb[3].mxu1  ;;  %v618_v32 = vadd.f32 %v2195_v25, %v552_v30  ;;  %v628_v33 = vsel %vm621_vm3, %v615_v27, -inf }
 0x389   : > { %v610_v28 = vadd.f32 %v609_v26, %v550_v23  ;;  %v622_v29 = vsel %vm621_vm3, %v607_v24, -inf }
 0x38a   : > { %623 = vmax.xlane.f32.xlu0 %v622_v29  ;;  %v632_v34 = vsel %vm631_vm4, %v618_v32, -inf }
 0x38b   : > { %v625_v31 = vsel %vm621_vm3, %v610_v28, -inf }
 0x38c   : > { %626 = vmax.xlane.f32.xlu1 %v625_v31 }
 0x38e   : > { %629 = vmax.xlane.f32.xlu0 %v628_v33 }
 0x392   : > { %633 = vmax.xlane.f32.xlu0 %v632_v34 }
 0x395   : > { %v2210_v35 = vpop.f32.mrb[4].mxu1 }
 0x396   : > { %v807_v36 = vpop.f32.mrb[5].mxu1  ;;  %v2661_v62 = vadd.f32 %v2210_v35, %v2064_v61 }
 0x397   : > { %v2211_v37 = vpop.f32.mrb[6].mxu1  ;;  %v2656_v60 = vadd.f32 %v2062_v59, %v807_v36 }
 0x398   : > { %v810_v38 = vpop.f32.mrb[7].mxu1  ;;  %v2671_v2 = vadd.f32 %v2211_v37, %v2065_v0  ;;  %v828_v4 = vsel %vm621_vm3, %v2661_v62, -inf }
 0x399   : > { %v822_v63 = vsel %vm621_vm3, %v2656_v60, -inf  ;;  %v2673_v3 = vadd.f32 %v2063_v1, %v810_v38 }
 0x39a   : > { %v831_v5 = vsel %vm631_vm4, %v2671_v2, -inf }
 0x39b   : > { %v825_v6 = vsel %vm621_vm3, %v2673_v3, -inf }
 0x39d   : > { %683 = vrot.lane.b32.xlu1 %v2589_v7, %s2474_s29 }
 0x417   : > { %v624_v39 = vpop.xlane.xlu0 %623 }
 0x418   : > { %v635_v40 = vsub.f32 %v607_v24, %v624_v39 }
 0x419   : > { %v627_v41 = vpop.xlane.xlu1 %626 }
 0x41a   : > { %v639_v44 = vmul.f32 1.442695, %v635_v40  ;;  %v636_v45 = vsub.f32 %v610_v28, %v627_v41 }
 0x41b   : > { %v630_v42 = vpop.xlane.xlu0 %629 }
 0x41c   : > { %v637_v43 = vsub.f32 %v615_v27, %v630_v42  ;;  %v641_v49 = vmul.f32 1.442695, %v636_v45 }
 0x41d   : > { %v684_v9 = vpop.permute.xlu1 %683 }
 0x41e   : > { %v643_v46 = vmul.f32 1.442695, %v637_v43  ;;  %v694_v16 = vsel %vm692_vm5, %v684_v9, 0 }
 0x41f   : > { %v634_v47 = vpop.xlane.xlu0 %633 }
 0x420   : > { %2371 = vpow2.f32 %v643_v46  ;;  %v638_v48 = vsub.f32 %v618_v32, %v634_v47 }
 0x421   : > { %2373 = vpow2.f32 %v639_v44 }
 0x422   : > { %v645_v50 = vmul.f32 1.442695, %v638_v48 }
 0x424   : > { %2375 = vpow2.f32 %v645_v50 }
 0x425   : > { %2377 = vpow2.f32 %v641_v49 }
 0x42a   : > { %v2631_v51 = vpop.eup %2371 }
 0x42b   : > { %v653_v52 = vsel %vm621_vm3, %v2631_v51, 0.0  ;;  %v2635_v53 = vpop.eup %2373 }
 0x42c   : > { %654 = vadd.xlane.f32.xlu0 %v653_v52  ;;  %v647_v55 = vsel %vm621_vm3, %v2635_v53, 0.0 }
 0x42e   : > { %v2637_v54 = vpop.eup %2375 }
 0x42f   : > { %v656_v56 = vsel %vm631_vm4, %v2637_v54, 0.0  ;;  %v2643_v57 = vpop.eup %2377 }
 0x430   : > { %648 = vadd.xlane.f32.xlu0 %v647_v55  ;;  %657 = vadd.xlane.f32.xlu1 %v656_v56  ;;  %v650_v58 = vsel %vm621_vm3, %v2643_v57, 0.0 }
 0x434   : > { %651 = vadd.xlane.f32.xlu1 %v650_v58 }
 0x445   : > { %1073 = vrot.lane.b32.xlu1 %v2591_v8, %s2475_s30 }
 0x446   : > { %681 = vrot.lane.b32.xlu0 %v2591_v8, %s2474_s29 }
 0x449   : > { %1075 = vrot.lane.b32.xlu1 %v2589_v7, %s2475_s30 }
 0x44a   : > { %1069 = vrot.lane.b32.xlu0 %v2591_v8, %s2476_s12 }
 0x44d   : > { %1071 = vrot.lane.b32.xlu1 %v2589_v7, %s2476_s12 }
 0x469   : > { %823 = vmax.xlane.f32.xlu0 %v822_v63 }
 0x46d   : > { %829 = vmax.xlane.f32.xlu0 %v828_v4 }
 0x471   : > { %832 = vmax.xlane.f32.xlu0 %v831_v5  ;;  %826 = vmax.xlane.f32.xlu1 %v825_v6 }
 0x4b9   : > { %v655_v10 = vpop.xlane.xlu0 %654 }
 0x4ba   : > { %2379 = vrcp.f32 %v655_v10 }
 0x4bd   : > { %v658_v11 = vpop.xlane.xlu1 %657  ;;  %v649_v12 = vpop.xlane.xlu0 %648 }
 0x4be   : > { %2381 = vrcp.f32 %v658_v11 }
 0x4bf   : > { %2383 = vrcp.f32 %v649_v12 }
 0x4c1   : > { %v652_v13 = vpop.xlane.xlu1 %651  ;;  %v682_v14 = vpop.permute.xlu0 %681 }
 0x4c2   : > { %2385 = vrcp.f32 %v652_v13  ;;  %2196 = vmatprep.subr.bf16.mxu0 %v682_v14 }
 0x4c3   : > { %2197 = vmatpush3.bf16.msra.mxu0 %v682_v14 }
 0x4c4   : > { %2318 = vmatprep.subr.msk.bf16.mxu0 %vm692_vm5, %v684_v9  ;;  %v2380_v15 = vpop.eup %2379 }
 0x4c5   : > { %v1074_v17 = vpop.permute.xlu1 %1073  ;;  %v665_v19 = vmul.f32 %v2380_v15, %v655_v10  ;;  %v1070_v40 = vpop.permute.xlu0 %1069 }
 0x4c6   : > { %v1084_v39 = vsel %vm559_vm2, %v1074_v17, 0 }
 0x4c7   : > { %2199 = vmatpush3.bf16.msra.mxu0 %v694_v16  ;;  %v669_v25 = vsub.f32 2.0, %v665_v19 }
 0x4c8   : > { %v2382_v18 = vpop.eup %2381  ;;  %2324 = vmatprep.subr.msk.bf16.mxu0 %vm559_vm2, %v1074_v17 }
 0x4c9   : > { %v2384_v20 = vpop.eup %2383  ;;  %v666_v21 = vmul.f32 %v2382_v18, %v658_v11  ;;  %v673_v31 = vmul.f32 %v2380_v15, %v669_v25  ;;  %v1076_v41 = vpop.permute.xlu1 %1075 }
 0x4ca   : > { %v663_v22 = vmul.f32 %v2384_v20, %v649_v12  ;;  %v1087_v42 = vsel %vm559_vm2, %v1076_v41, 0 }
 0x4cb   : > { %v670_v23 = vsub.f32 2.0, %v666_v21  ;;  %v677_v36 = vmul.f32 %v2631_v51, %v673_v31 }
 0x4cc   : > { %v2386_v24 = vpop.eup %2385  ;;  %v667_v26 = vsub.f32 2.0, %v663_v22 }
 0x4cd   : > { %v664_v27 = vmul.f32 %v2386_v24, %v652_v13  ;;  %v674_v28 = vmul.f32 %v2382_v18, %v670_v23  ;;  %v1072_v43 = vpop.permute.xlu1 %1071 }
 0x4ce   : > { %v671_v29 = vmul.f32 %v2384_v20, %v667_v26 }
 0x4cf   : > { %v668_v30 = vsub.f32 2.0, %v664_v27  ;;  %v678_v33 = vmul.f32 %v2637_v54, %v674_v28 }
 0x4d0   : > { %v675_v34 = vmul.f32 %v2635_v53, %v671_v29 }
 0x4d1   : > { %v672_v32 = vmul.f32 %v2386_v24, %v668_v30  ;;  %v680_v38 = vpack.c.bf16 %v678_v33, %v677_v36 }
 0x4d3   : > { %v676_v35 = vmul.f32 %v2643_v57, %v672_v32 }
 0x4d5   : > { %v679_v37 = vpack.c.bf16 %v676_v35, %v675_v34 }
 0x4d7   : > { %2200 = vmatprep.mubr.msk.bf16.mxu0 %vm621_vm3, %v679_v37 }
 0x4d8   : > { %2201 = vmatmul.mubr.msk.bf16.vlgmr.msra.gmra.mrb[4].mxu0 %vm621_vm3, %v680_v38 }
 0x4d9   : > { %2233 = vmatpush3.bf16.xpose.msra.mxu0 %v1084_v39  ;;  %2236 = vmatprep.mubr.msk.bf16.mxu0 %vm559_vm2, %v1070_v40 }
 0x4da   : > { %2325 = vmatprep.subr.msk.bf16.mxu0 %vm559_vm2, %v1076_v41 }
 0x4e1   : > { %2235 = vmatpush3.bf16.xpose.msra.mxu0 %v1087_v42 }
 0x4e8   : > { %2237 = vmatmul.mubr.msk.bf16.vlgmr.msra.gmra.mrb[8].mxu0 %vm559_vm2, %v1072_v43  ;;  %v2075_v43 = vld [vmem:[%s2972_s4 + $0x40] sm:$0xff] }
 0x4f6   : > { %v824_v44 = vpop.xlane.xlu0 %823 }
 0x4f7   : > { %v834_v45 = vsub.f32 %v2656_v60, %v824_v44 }
 0x4f9   : > { %v838_v48 = vmul.f32 1.442695, %v834_v45  ;;  %v2077_v45 = vld [vmem:[%s2972_s4 + $0x50] sm:$0xff] }
 0x4fa   : > { %v830_v46 = vpop.xlane.xlu0 %829 }
 0x4fb   : > { %v836_v47 = vsub.f32 %v2661_v62, %v830_v46 }
 0x4fd   : > { %v842_v49 = vmul.f32 1.442695, %v836_v47  ;;  %v2076_v47 = vld [vmem:[%s2972_s4 + $0x48] sm:$0xff] }
 0x4fe   : > { %v827_v50 = vpop.xlane.xlu1 %826  ;;  %v833_v51 = vpop.xlane.xlu0 %832 }
 0x4ff   : > { %2387 = vpow2.f32 %v842_v49  ;;  %v835_v52 = vsub.f32 %v2673_v3, %v827_v50  ;;  %v837_v53 = vsub.f32 %v2671_v2, %v833_v51 }
 0x500   : > { %2389 = vpow2.f32 %v838_v48 }
 0x501   : > { %v844_v54 = vmul.f32 1.442695, %v837_v53  ;;  %v840_v55 = vmul.f32 1.442695, %v835_v52 }
 0x503   : > { %2391 = vpow2.f32 %v844_v54  ;;  %v2078_v54 = vld [vmem:[%s2972_s4 + $0x58] sm:$0xf] }
 0x504   : > { %2393 = vpow2.f32 %v840_v55 }
 0x509   : > { %v2699_v56 = vpop.eup %2387 }
 0x50a   : > { %v852_v57 = vsel %vm621_vm3, %v2699_v56, 0.0  ;;  %v2703_v58 = vpop.eup %2389 }
 0x50b   : > { %853 = vadd.xlane.f32.xlu0 %v852_v57  ;;  %v846_v60 = vsel %vm621_vm3, %v2703_v58, 0.0 }
 0x50d   : > { %v2392_v59 = vpop.eup %2391 }
 0x50e   : > { %v855_v61 = vsel %vm631_vm4, %v2392_v59, 0.0  ;;  %v2394_v62 = vpop.eup %2393 }
 0x50f   : > { %847 = vadd.xlane.f32.xlu0 %v846_v60  ;;  %856 = vadd.xlane.f32.xlu1 %v855_v61  ;;  %v849_v63 = vsel %vm621_vm3, %v2394_v62, 0.0  ;;  %v747_v61 = vld [vmem:[%s2973_s5] sm:$0xf] }
 0x513   : > { %850 = vadd.xlane.f32.xlu1 %v849_v63 }
 0x524   : > { %882 = vrot.lane.b32.xlu1 %v2589_v7, %s2477_s25 }
 0x525   : > { %880 = vrot.lane.b32.xlu0 %v2591_v8, %s2477_s25  ;;  %s2480_s25 = smov 48  }
 0x528   : > { %1334 = vrot.lane.b32.xlu1 %v2591_v8, %s2478_s26 }
 0x529   : > { %1330 = vrot.lane.b32.xlu0 %v2591_v8, %s2479_s27 }
 0x52c   : > { %1336 = vrot.lane.b32.xlu1 %v2589_v7, %s2478_s26 }
 0x530   : > { %1332 = vrot.lane.b32.xlu1 %v2589_v7, %s2479_s27 }
 0x598   : > { %v854_v0 = vpop.xlane.xlu0 %853 }
 0x599   : > { %2395 = vrcp.f32 %v854_v0 }
 0x59c   : > { %v848_v1 = vpop.xlane.xlu0 %847  ;;  %v857_v2 = vpop.xlane.xlu1 %856 }
 0x59d   : > { %2397 = vrcp.f32 %v848_v1 }
 0x59e   : > { %2399 = vrcp.f32 %v857_v2 }
 0x5a0   : > { %v881_v3 = vpop.permute.xlu0 %880  ;;  %v851_v4 = vpop.xlane.xlu1 %850 }
 0x5a1   : > { %2212 = vmatprep.subr.bf16.mxu1 %v881_v3  ;;  %2401 = vrcp.f32 %v851_v4 }
 0x5a2   : > { %2213 = vmatpush3.bf16.msra.mxu1 %v881_v3 }
 0x5a3   : > { %v2396_v6 = vpop.eup %2395 }
 0x5a4   : > { %v1331_v5 = vpop.permute.xlu0 %1330  ;;  %v883_v9 = vpop.permute.xlu1 %882  ;;  %v864_v13 = vmul.f32 %v2396_v6, %v854_v0 }
 0x5a5   : > { %2258 = vmatprep.mubr.msk.bf16.mxu0 %vm559_vm2, %v1331_v5  ;;  %v892_v10 = vsel %vm692_vm5, %v883_v9, 0  ;;  %2321 = vmatprep.subr.msk.bf16.mxu1 %vm692_vm5, %v883_v9 }
 0x5a6   : > { %2215 = vmatpush3.bf16.msra.mxu1 %v892_v10  ;;  %v868_v22 = vsub.f32 2.0, %v864_v13 }
 0x5a7   : > { %v2398_v11 = vpop.eup %2397 }
 0x5a8   : > { %v2400_v12 = vpop.eup %2399  ;;  %v862_v14 = vmul.f32 %v2398_v11, %v848_v1  ;;  %v1335_v16 = vpop.permute.xlu1 %1334  ;;  %v872_v33 = vmul.f32 %v2396_v6, %v868_v22 }
 0x5a9   : > { %v865_v15 = vmul.f32 %v2400_v12, %v857_v2  ;;  %v1345_v17 = vsel %vm559_vm2, %v1335_v16, 0  ;;  %2328 = vmatprep.subr.msk.bf16.mxu0 %vm559_vm2, %v1335_v16 }
 0x5aa   : > { %v866_v19 = vsub.f32 2.0, %v862_v14  ;;  %2255 = vmatpush3.bf16.xpose.msra.mxu0 %v1345_v17  ;;  %v876_v39 = vmul.f32 %v2699_v56, %v872_v33 }
 0x5ab   : > { %v869_v18 = vsub.f32 2.0, %v865_v15  ;;  %v2720_v20 = vpop.f32.mrb[4].mxu0  ;;  %v2402_v21 = vpop.eup %2401 }
 0x5ac   : > { %v2722_v23 = vpop.f32.mrb[5].mxu0  ;;  %v863_v24 = vmul.f32 %v2402_v21, %v851_v4  ;;  %v1337_v25 = vpop.permute.xlu1 %1336  ;;  %v870_v30 = vmul.f32 %v2398_v11, %v866_v19 }
 0x5ad   : > { %v2724_v26 = vpop.f32.mrb[6].mxu0  ;;  %v873_v27 = vmul.f32 %v2400_v12, %v869_v18  ;;  %2329 = vmatprep.subr.msk.bf16.mxu0 %vm559_vm2, %v1337_v25  ;;  %v1348_v36 = vsel %vm559_vm2, %v1337_v25, 0 }
 0x5ae   : > { %v746_v28 = vpack.c.bf16 %v2724_v26, %v2720_v20  ;;  %v2729_v29 = vpop.f32.mrb[7].mxu0  ;;  %v867_v31 = vsub.f32 2.0, %v863_v24  ;;  %v874_v37 = vmul.f32 %v2703_v58, %v870_v30 }
 0x5af   : > { %v745_v32 = vpack.c.bf16 %v2729_v29, %v2722_v23  ;;  %v877_v35 = vmul.f32 %v2392_v59, %v873_v27  ;;  %v2070_v59 = vld [vmem:[%s2973_s5 + $0x4] sm:$0xf]  ;;  %v2089_v23 = vld [vmem:[%s2972_s4 + $0x78] sm:$0xf] }
 0x5b0   : > { %v871_v34 = vmul.f32 %v2402_v21, %v867_v31  ;;  %v1333_v42 = vpop.permute.xlu1 %1332  ;;  %2322 = vmatprep.subr.msk.bf16.mxu1 %vm953_vm6, %v2070_v59  ;;  %v955_v60 = vsel %vm953_vm6, %v2070_v59, 0 }
 0x5b1   : > { %v879_v41 = vpack.c.bf16 %v877_v35, %v876_v39  ;;  %v2088_v39 = vld [vmem:[%s2972_s4 + $0x70] sm:$0xff] }
 0x5b2   : > { %v875_v38 = vmul.f32 %v2394_v62, %v871_v34  ;;  %2257 = vmatpush3.bf16.xpose.msra.mxu0 %v1348_v36  ;;  %v1013_v36 = vsel %vm953_vm6, %v747_v61, 0 }
 0x5b4   : > { %v878_v40 = vpack.c.bf16 %v875_v38, %v874_v37  ;;  %v2087_v37 = vld [vmem:[%s2972_s4 + $0x68] sm:$0xff] }
 0x5b6   : > { %2216 = vmatprep.mubr.msk.bf16.mxu1 %vm621_vm3, %v878_v40  ;;  %v2086_v40 = vld [vmem:[%s2972_s4 + $0x60] sm:$0xff] }
 0x5b7   : > { %2217 = vmatmul.mubr.msk.bf16.vlgmr.msra.gmra.mrb[8].mxu1 %vm621_vm3, %v879_v41 }
 0x5b8   : > { %2221 = vmatpush3.bf16.msra.mxu1 %v955_v60 }
 0x5b9   : > { %2259 = vmatmul.mubr.msk.bf16.vlgmr.msra.gmra.mrb[12].mxu0 %vm559_vm2, %v1333_v42  ;;  %2323 = vmatprep.subr.msk.bf16.mxu1 %vm953_vm6, %v747_v61 }
 0x5bb   : > { %v2238_v44 = vpop.f32.mrb[8].mxu0 }
 0x5bc   : > { %v1123_v46 = vpop.f32.mrb[9].mxu0  ;;  %v1132_v51 = vadd.f32 %v2238_v44, %v2077_v45 }
 0x5bd   : > { %v1124_v48 = vadd.f32 %v2075_v43, %v1123_v46  ;;  %v2239_v49 = vpop.f32.mrb[10].mxu0 }
 0x5be   : > { %v1126_v50 = vpop.f32.mrb[11].mxu0  ;;  %v1135_v56 = vadd.f32 %v2239_v49, %v2078_v54  ;;  %v1144_v57 = vsel %vm621_vm3, %v1132_v51, -inf }
 0x5bf   : > { %v1127_v52 = vadd.f32 %v2076_v47, %v1126_v50  ;;  %v1138_v53 = vsel %vm621_vm3, %v1124_v48, -inf }
 0x5c0   : > { %1139 = vmax.xlane.f32.xlu0 %v1138_v53  ;;  %v1147_v58 = vsel %vm631_vm4, %v1135_v56, -inf }
 0x5c1   : > { %v1141_v55 = vsel %vm621_vm3, %v1127_v52, -inf }
 0x5c2   : > { %1142 = vmax.xlane.f32.xlu1 %v1141_v55 }
 0x5c4   : > { %1145 = vmax.xlane.f32.xlu0 %v1144_v57 }
 0x5c8   : > { %1148 = vmax.xlane.f32.xlu0 %v1147_v58 }
 0x64d   : > { %v1140_v62 = vpop.xlane.xlu0 %1139 }
 0x64e   : > { %v1150_v63 = vsub.f32 %v1124_v48, %v1140_v62 }
 0x64f   : > { %v1143_v0 = vpop.xlane.xlu1 %1142 }
 0x650   : > { %v1154_v3 = vmul.f32 1.442695, %v1150_v63  ;;  %v1151_v4 = vsub.f32 %v1127_v52, %v1143_v0 }
 0x651   : > { %v1146_v1 = vpop.xlane.xlu0 %1145 }
 0x652   : > { %v1152_v2 = vsub.f32 %v1132_v51, %v1146_v1  ;;  %v1156_v10 = vmul.f32 1.442695, %v1151_v4 }
 0x654   : > { %v1158_v5 = vmul.f32 1.442695, %v1152_v2 }
 0x655   : > { %v1149_v6 = vpop.xlane.xlu0 %1148 }
 0x656   : > { %2403 = vpow2.f32 %v1158_v5  ;;  %v1153_v9 = vsub.f32 %v1135_v56, %v1149_v6 }
 0x657   : > { %2405 = vpow2.f32 %v1154_v3 }
 0x658   : > { %v1160_v11 = vmul.f32 1.442695, %v1153_v9 }
 0x65a   : > { %2407 = vpow2.f32 %v1160_v11 }
 0x65b   : > { %2409 = vpow2.f32 %v1156_v10 }
 0x660   : > { %v2764_v12 = vpop.eup %2403 }
 0x661   : > { %v1168_v13 = vsel %vm621_vm3, %v2764_v12, 0.0  ;;  %v2768_v14 = vpop.eup %2405 }
 0x662   : > { %1169 = vadd.xlane.f32.xlu0 %v1168_v13  ;;  %v1162_v16 = vsel %vm621_vm3, %v2768_v14, 0.0 }
 0x664   : > { %v2770_v15 = vpop.eup %2407 }
 0x665   : > { %v1171_v17 = vsel %vm631_vm4, %v2770_v15, 0.0  ;;  %v2776_v18 = vpop.eup %2409 }
 0x666   : > { %1163 = vadd.xlane.f32.xlu0 %v1162_v16  ;;  %1172 = vadd.xlane.f32.xlu1 %v1171_v17  ;;  %v1165_v19 = vsel %vm621_vm3, %v2776_v18, 0.0 }
 0x66a   : > { %1166 = vadd.xlane.f32.xlu1 %v1165_v19 }
 0x67b   : > { %1198 = vrot.lane.b32.xlu1 %v2589_v7, %s2480_s25 }
 0x67c   : > { %1196 = vrot.lane.b32.xlu0 %v2591_v8, %s2480_s25 }
 0x68a   : > { %v2218_v21 = vpop.f32.mrb[8].mxu1 }
 0x68b   : > { %v928_v22 = vpop.f32.mrb[9].mxu1 }
 0x68c   : > { %v2219_v24 = vpop.f32.mrb[10].mxu1  ;;  %v2260_v25 = vpop.f32.mrb[12].mxu0 }
 0x68d   : > { %v944_v27 = vpack.c.bf16 %v2219_v24, %v2218_v21  ;;  %v931_v30 = vpop.f32.mrb[11].mxu1  ;;  %v1384_v31 = vpop.f32.mrb[13].mxu0  ;;  %v1393_v41 = vadd.f32 %v2260_v25, %v2088_v39 }
 0x68e   : > { %v943_v33 = vpack.c.bf16 %v931_v30, %v928_v22  ;;  %v2261_v34 = vpop.f32.mrb[14].mxu0  ;;  %v1385_v42 = vadd.f32 %v2086_v40, %v1384_v31 }
 0x68f   : > { %v1387_v35 = vpop.f32.mrb[15].mxu0  ;;  %v1396_v29 = vadd.f32 %v2261_v34, %v2089_v23 }
 0x690   : > { %2222 = vmatprep.mubr.msk.bf16.mxu1 %vm559_vm2, %v943_v33  ;;  %v2792_v38 = vadd.f32 %v2087_v37, %v1387_v35  ;;  %v1399_v44 = vsel %vm621_vm3, %v1385_v42, -inf }
 0x691   : > { %2223 = vmatmul.mubr.msk.bf16.vlgmr.msra.gmra.mrb[12].mxu1 %vm559_vm2, %v944_v27  ;;  %v1408_v45 = vsel %vm631_vm4, %v1396_v29, -inf }
 0x692   : > { %2228 = vmatprep.mubr.msk.bf16.mxu1 %vm559_vm2, %v745_v32  ;;  %2227 = vmatpush3.bf16.msra.mxu1 %v1013_v36  ;;  %v1402_v43 = vsel %vm621_vm3, %v2792_v38, -inf  ;;  %v1405_v32 = vsel %vm621_vm3, %v1393_v41, -inf  ;;  %v2083_v36 = vld [vmem:[%s2973_s5 + $0x8] sm:$0xf] }
 0x693   : > { %v1270_v37 = vsel %vm953_vm6, %v2083_v36, 0 }
 0x69b   : > { %1403 = vmax.xlane.f32.xlu0 %v1402_v43 }
 0x69d   : > { %2229 = vmatmul.mubr.msk.bf16.vlgmr.msra.gmra.mrb[12].mxu1 %vm559_vm2, %v746_v28 }
 0x69f   : > { %1406 = vmax.xlane.f32.xlu0 %v1405_v32  ;;  %1400 = vmax.xlane.f32.xlu1 %v1399_v44 }
 0x6a3   : > { %1409 = vmax.xlane.f32.xlu1 %v1408_v45 }
 0x6ef   : > { %v1170_v46 = vpop.xlane.xlu0 %1169 }
 0x6f0   : > { %2411 = vrcp.f32 %v1170_v46 }
 0x6f3   : > { %v1173_v47 = vpop.xlane.xlu1 %1172  ;;  %v1164_v48 = vpop.xlane.xlu0 %1163 }
 0x6f4   : > { %2413 = vrcp.f32 %v1173_v47 }
 0x6f5   : > { %2415 = vrcp.f32 %v1164_v48 }
 0x6f7   : > { %v1167_v49 = vpop.xlane.xlu1 %1166  ;;  %v1197_v50 = vpop.permute.xlu0 %1196 }
 0x6f8   : > { %2417 = vrcp.f32 %v1167_v49  ;;  %2240 = vmatprep.subr.bf16.mxu1 %v1197_v50 }
 0x6f9   : > { %2241 = vmatpush3.bf16.msra.mxu1 %v1197_v50 }
 0x6fa   : > { %v2412_v20 = vpop.eup %2411 }
 0x6fb   : > { %v1199_v26 = vpop.permute.xlu1 %1198  ;;  %v1180_v52 = vmul.f32 %v2412_v20, %v1170_v46 }
 0x6fc   : > { %v1208_v28 = vsel %vm692_vm5, %v1199_v26, 0  ;;  %2326 = vmatprep.subr.msk.bf16.mxu1 %vm692_vm5, %v1199_v26 }
 0x6fd   : > { %2243 = vmatpush3.bf16.msra.mxu1 %v1208_v28  ;;  %v1184_v58 = vsub.f32 2.0, %v1180_v52 }
 0x6fe   : > { %v2414_v51 = vpop.eup %2413  ;;  %2327 = vmatprep.subr.msk.bf16.mxu1 %vm953_vm6, %v2083_v36 }
 0x6ff   : > { %v2416_v53 = vpop.eup %2415  ;;  %v1181_v54 = vmul.f32 %v2414_v51, %v1173_v47  ;;  %v1188_v0 = vmul.f32 %v2412_v20, %v1184_v58 }
 0x700   : > { %v1178_v55 = vmul.f32 %v2416_v53, %v1164_v48 }
 0x701   : > { %v1185_v56 = vsub.f32 2.0, %v1181_v54  ;;  %v1192_v5 = vmul.f32 %v2764_v12, %v1188_v0 }
 0x702   : > { %v2418_v57 = vpop.eup %2417  ;;  %v1182_v59 = vsub.f32 2.0, %v1178_v55 }
 0x703   : > { %v1179_v60 = vmul.f32 %v2418_v57, %v1167_v49  ;;  %v1189_v61 = vmul.f32 %v2414_v51, %v1185_v56 }
 0x704   : > { %v1186_v62 = vmul.f32 %v2416_v53, %v1182_v59 }
 0x705   : > { %v1183_v63 = vsub.f32 2.0, %v1179_v60  ;;  %v1193_v2 = vmul.f32 %v2770_v15, %v1189_v61 }
 0x706   : > { %v1190_v3 = vmul.f32 %v2768_v14, %v1186_v62  ;;  %v2094_v62 = vld [vmem:[%s2973_s5 + $0xc] sm:$0xf] }
 0x707   : > { %v1187_v1 = vmul.f32 %v2418_v57, %v1183_v63  ;;  %v1195_v9 = vpack.c.bf16 %v1193_v2, %v1192_v5  ;;  %v1531_v2 = vsel %vm953_vm6, %v2094_v62, 0 }
 0x709   : > { %v1191_v4 = vmul.f32 %v2776_v18, %v1187_v1 }
 0x70b   : > { %v1194_v6 = vpack.c.bf16 %v1191_v4, %v1190_v3 }
 0x70d   : > { %2244 = vmatprep.mubr.msk.bf16.mxu1 %vm621_vm3, %v1194_v6 }
 0x70e   : > { %2245 = vmatmul.mubr.msk.bf16.vlgmr.msra.gmra.mrb[16].mxu1 %vm621_vm3, %v1195_v9 }
 0x70f   : > { %2249 = vmatpush3.bf16.msra.mxu1 %v1270_v37 }
 0x728   : > { %v1404_v10 = vpop.xlane.xlu0 %1403 }
 0x729   : > { %v1412_v19 = vsub.f32 %v2792_v38, %v1404_v10 }
 0x72b   : > { %v1417_v18 = vmul.f32 1.442695, %v1412_v19 }
 0x72c   : > { %v1401_v11 = vpop.xlane.xlu1 %1400  ;;  %v1407_v13 = vpop.xlane.xlu0 %1406 }
 0x72d   : > { %v1411_v16 = vsub.f32 %v1385_v42, %v1401_v11  ;;  %v1413_v17 = vsub.f32 %v1393_v41, %v1407_v13  ;;  %v2097_v13 = vld [vmem:[%s2974_s6] ss:$0 sm:$0xff] }
 0x72f   : > { %v1419_v15 = vmul.f32 1.442695, %v1413_v17  ;;  %v1415_v21 = vmul.f32 1.442695, %v1411_v16  ;;  %v2459_v17 = vld [vmem:[%s2558_s22] sm:$0xff] }
 0x730   : > { %v1410_v14 = vpop.xlane.xlu1 %1409 }
 0x731   : > { %v1414_v22 = vsub.f32 %v1396_v29, %v1410_v14  ;;  %2419 = vpow2.f32 %v1419_v15 }
 0x732   : > { %2421 = vpow2.f32 %v1415_v21  ;;  %v2460_v21 = vld [vmem:[%s2558_s22 + $0x18] sm:$0xf] }
 0x733   : > { %v1421_v12 = vmul.f32 1.442695, %v1414_v22 }
 0x735   : > { %2423 = vpow2.f32 %v1421_v12 }
 0x736   : > { %2425 = vpow2.f32 %v1417_v18  ;;  %v2461_v18 = vld [vmem:[%s2558_s22 + $0x10] sm:$0xff] }
 0x73b   : > { %v2420_v24 = vpop.eup %2419 }
 0x73c   : > { %v1429_v25 = vsel %vm621_vm3, %v2420_v24, 0.0  ;;  %v2422_v27 = vpop.eup %2421 }
 0x73d   : > { %1430 = vadd.xlane.f32.xlu0 %v1429_v25  ;;  %v1423_v34 = vsel %vm621_vm3, %v2422_v27, 0.0  ;;  %v2462_v25 = vld [vmem:[%s2558_s22 + $0x8] sm:$0xff] }
 0x73f   : > { %v2424_v30 = vpop.eup %2423 }
 0x740   : > { %v1432_v31 = vsel %vm631_vm4, %v2424_v30, 0.0  ;;  %v2426_v33 = vpop.eup %2425 }
 0x741   : > { %1433 = vadd.xlane.f32.xlu1 %v1432_v31  ;;  %1424 = vadd.xlane.f32.xlu0 %v1423_v34  ;;  %v1426_v35 = vsel %vm621_vm3, %v2426_v33, 0.0 }
 0x745   : > { %1427 = vadd.xlane.f32.xlu1 %v1426_v35 }
 0x756   : > { %1459 = vrot.lane.b32.xlu1 %v2589_v7, %s2481_s20 }
 0x757   : > { %1457 = vrot.lane.b32.xlu0 %v2591_v8, %s2481_s20 }
 0x7ca   : > { %v1431_v38 = vpop.xlane.xlu0 %1430 }
 0x7ce   : > { %v1434_v39 = vpop.xlane.xlu1 %1433  ;;  %v1425_v40 = vpop.xlane.xlu0 %1424 }
 0x7cf   : > { %2427 = vrcp.f32 %v1425_v40 }
 0x7d0   : > { %2429 = vrcp.f32 %v1434_v39 }
 0x7d1   : > { %2431 = vrcp.f32 %v1431_v38 }
 0x7d2   : > { %v1428_v41 = vpop.xlane.xlu1 %1427  ;;  %v1458_v42 = vpop.permute.xlu0 %1457 }
 0x7d3   : > { %2433 = vrcp.f32 %v1428_v41  ;;  %2262 = vmatprep.subr.bf16.mxu1 %v1458_v42 }
 0x7d6   : > { %v1460_v60 = vpop.permute.xlu1 %1459 }
 0x7d7   : > { %v1469_v0 = vsel %vm692_vm5, %v1460_v60, 0 }
 0x7d9   : > { %v2428_v43 = vpop.eup %2427 }
 0x7da   : > { %v2430_v23 = vpop.eup %2429  ;;  %v1439_v29 = vmul.f32 %v2428_v43, %v1425_v40 }
 0x7db   : > { %v2432_v32 = vpop.eup %2431  ;;  %v1442_v46 = vmul.f32 %v2430_v23, %v1434_v39 }
 0x7dc   : > { %v1443_v45 = vsub.f32 2.0, %v1439_v29  ;;  %v1441_v47 = vmul.f32 %v2432_v32, %v1431_v38 }
 0x7dd   : > { %v2434_v44 = vpop.eup %2433  ;;  %v1446_v50 = vsub.f32 2.0, %v1442_v46 }
 0x7de   : > { %v1440_v7 = vmul.f32 %v2434_v44, %v1428_v41  ;;  %v1447_v8 = vmul.f32 %v2428_v43, %v1443_v45  ;;  %v1445_v51 = vsub.f32 2.0, %v1441_v47 }
 0x7df   : > { %v1450_v57 = vmul.f32 %v2430_v23, %v1446_v50 }
 0x7e0   : > { %v1444_v48 = vsub.f32 2.0, %v1440_v7  ;;  %v1451_v52 = vmul.f32 %v2422_v27, %v1447_v8  ;;  %v1449_v59 = vmul.f32 %v2432_v32, %v1445_v51  ;;  %v2354_v51 = vld [vmem:[%s2975_s7 + $0x8] sm:$0xff]  }
 0x7e1   : > { %v2246_v49 = vpop.f32.mrb[16].mxu1  ;;  %v1454_v61 = vmul.f32 %v2424_v30, %v1450_v57 }
 0x7e2   : > { %v1448_v20 = vmul.f32 %v2434_v44, %v1444_v48  ;;  %v1244_v26 = vpop.f32.mrb[17].mxu1  ;;  %v1453_v63 = vmul.f32 %v2420_v24, %v1449_v59 }
 0x7e3   : > { %v2247_v28 = vpop.f32.mrb[18].mxu1 }
 0x7e4   : > { %v1452_v53 = vmul.f32 %v2426_v33, %v1448_v20  ;;  %v1260_v54 = vpack.c.bf16 %v2247_v28, %v2246_v49  ;;  %v1247_v55 = vpop.f32.mrb[19].mxu1  ;;  %v1456_v1 = vpack.c.bf16 %v1454_v61, %v1453_v63  ;;  %v2353_v28 = vld [vmem:[%s2975_s7] sm:$0xff]  }
 0x7e5   : > { %v1259_v56 = vpack.c.bf16 %v1247_v55, %v1244_v26  ;;  %2276 = vmatprep.subr.bf16.mxu0 %v2353_v28 }
 0x7e6   : > { %v1455_v58 = vpack.c.bf16 %v1452_v53, %v1451_v52  ;;  %2277 = vmatpush3.bf16.msra.mxu0 %v2353_v28 }
 0x7e7   : > { %2250 = vmatprep.mubr.msk.bf16.mxu1 %vm559_vm2, %v1259_v56  ;;  %2278 = vmatprep.subr.bf16.mxu0 %v2354_v51 }
 0x7e8   : > { %2251 = vmatmul.mubr.msk.bf16.vlgmr.msra.gmra.mrb[12].mxu1 %vm559_vm2, %v1260_v54 }
 0x7e9   : > { %2263 = vmatpush3.bf16.msra.mxu1 %v1458_v42  ;;  %2266 = vmatprep.mubr.msk.bf16.mxu1 %vm621_vm3, %v1455_v58 }
 0x7ea   : > { %2330 = vmatprep.subr.msk.bf16.mxu1 %vm692_vm5, %v1460_v60  ;;  %2279 = vmatpush3.bf16.msra.mxu0 %v2354_v51 }
 0x7ed   : > { %2265 = vmatpush3.bf16.msra.mxu1 %v1469_v0 }
 0x7ee   : > { %2331 = vmatprep.subr.msk.bf16.mxu1 %vm953_vm6, %v2094_v62 }
 0x7f0   : > { %2267 = vmatmul.mubr.msk.bf16.vlgmr.msra.gmra.mrb[20].mxu1 %vm621_vm3, %v1456_v1  ;;  %v2098_v1 = vld [vmem:[%s2969_s1 + $0x2] ss:$0 sm:$0xff] }
 0x7f1   : > { %2271 = vmatpush3.bf16.msra.mxu1 %v1531_v2 }
 0x8c3   : > { %v2268_v3 = vpop.f32.mrb[20].mxu1 }
 0x8c4   : > { %v1505_v4 = vpop.f32.mrb[21].mxu1 }
 0x8c5   : > { %v2269_v5 = vpop.f32.mrb[22].mxu1 }
 0x8c6   : > { %v1521_v6 = vpack.c.bf16 %v2269_v5, %v2268_v3  ;;  %v1508_v9 = vpop.f32.mrb[23].mxu1 }
 0x8c7   : > { %v1520_v10 = vpack.c.bf16 %v1508_v9, %v1505_v4 }
 0x8c9   : > { %2272 = vmatprep.mubr.msk.bf16.mxu1 %vm559_vm2, %v1520_v10 }
 0x8ca   : > { %2273 = vmatmul.mubr.msk.bf16.vlgmr.msra.gmra.mrb[12].mxu1 %vm559_vm2, %v1521_v6  ;;  %v2099_v6 = vld [vmem:[%s2969_s1 + $0x3] ss:$0 sm:$0xff] }
 0x99d   : > { %v2274_v11 = vpop.f32.mrb[12].mxu1 }
 0x99e   : > { %v1567_v16 = vpop.f32.mrb[13].mxu1  ;;  %v1588_v12 = vadd.f32 %v2461_v18, %v2274_v11 }
 0x99f   : > { %v1586_v19 = vadd.f32 %v2459_v17, %v1567_v16  ;;  %v2275_v15 = vpop.f32.mrb[14].mxu1 }
 0x9a0   : > { %v1589_v14 = vadd.f32 %v2460_v21, %v2275_v15  ;;  %v1570_v22 = vpop.f32.mrb[15].mxu1  ;;  %v2860_v34 = vadd.f32 %v2097_v13, %v1588_v12 }
 0x9a1   : > { %v2851_v24 = vadd.f32 %v2097_v13, %v1586_v19  ;;  %v1587_v27 = vadd.f32 %v2462_v25, %v1570_v22  ;;  %v2355_v25 = vld [vmem:[%s2977_s9] sm:$0xff]  }
 0x9a2   : > { %v2854_v30 = vadd.f32 %v2097_v13, %v1589_v14  ;;  %v1607_v37 = vsel %vm396_vm0, %v2860_v34, 0.0  ;;  %2284 = vmatprep.subr.bf16.mxu0 %v2355_v25 }
 0x9a3   : > { %v2856_v31 = vadd.f32 %v2097_v13, %v1587_v27  ;;  %v1601_v33 = vsel %vm396_vm0, %v2851_v24, 0.0  ;;  %v2356_v27 = vld [vmem:[%s2977_s9 + $0x8] sm:$0xff]  }
 0x9a4   : > { %1602 = vadd.xlane.f32.xlu1 %v1601_v33  ;;  %v1610_v36 = vsel %vm406_vm1, %v2854_v30, 0.0  ;;  %v2357_v33 = vld [vmem:[%s2977_s9 + $0x10] sm:$0xff]  }
 0x9a5   : > { %v1604_v35 = vsel %vm396_vm0, %v2856_v31, 0.0 }
 0x9a6   : > { %1605 = vadd.xlane.f32.xlu0 %v1604_v35  ;;  %v2358_v35 = vld [vmem:[%s2977_s9 + $0x18] sm:$0xff]  }
 0x9a8   : > { %1611 = vadd.xlane.f32.xlu1 %v1610_v36  ;;  %v2359_v36 = vld [vmem:[%s2977_s9 + $0x20] sm:$0xff]  }
 0x9aa   : > { %1608 = vadd.xlane.f32.xlu0 %v1607_v37  ;;  %v2360_v37 = vld [vmem:[%s2977_s9 + $0x28] sm:$0xff]  }
 0xa31   : > { %v1603_v38 = vpop.xlane.xlu1 %1602 }
 0xa32   : > { %v1613_v39 = vmul.f32 0.03125, %v1603_v38  ;;  %v2361_v38 = vld [vmem:[%s2977_s9 + $0x30] sm:$0xff]  }
 0xa33   : > { %v1606_v40 = vpop.xlane.xlu0 %1605 }
 0xa34   : > { %v1617_v41 = vsub.f32 %v2851_v24, %v1613_v39  ;;  %v1614_v42 = vmul.f32 0.03125, %v1606_v40  ;;  %v2362_v39 = vld [vmem:[%s2977_s9 + $0x38] sm:$0xff]   ;;  %v2100_v40 = vld [vmem:[%s2976_s8] ss:$0 sm:$0xff] }
 0xa35   : > { %v1612_v43 = vpop.xlane.xlu1 %1611 }
 0xa36   : > { %v1618_v23 = vsub.f32 %v2856_v31, %v1614_v42  ;;  %v1616_v29 = vmul.f32 0.03125, %v1612_v43  ;;  %v1621_v32 = vmul.f32 %v1617_v41, %v1617_v41 }
 0xa37   : > { %v1609_v44 = vpop.xlane.xlu0 %1608 }
 0xa38   : > { %v1620_v45 = vsub.f32 %v2854_v30, %v1616_v29  ;;  %v1615_v46 = vmul.f32 0.03125, %v1609_v44  ;;  %v1625_v7 = vsel %vm396_vm0, %v1621_v32, 0.0  ;;  %v1622_v47 = vmul.f32 %v1618_v23, %v1618_v23 }
 0xa39   : > { %1626 = vadd.xlane.f32.xlu0 %v1625_v7 }
 0xa3a   : > { %v1619_v8 = vsub.f32 %v2860_v34, %v1615_v46  ;;  %v1628_v48 = vsel %vm396_vm0, %v1622_v47, 0.0  ;;  %v1624_v49 = vmul.f32 %v1620_v45, %v1620_v45 }
 0xa3b   : > { %1629 = vadd.xlane.f32.xlu1 %v1628_v48 }
 0xa3c   : > { %v1623_v50 = vmul.f32 %v1619_v8, %v1619_v8  ;;  %v1634_v20 = vsel %vm406_vm1, %v1624_v49, 0.0 }
 0xa3e   : > { %v1631_v26 = vsel %vm396_vm0, %v1623_v50, 0.0 }
 0xa3f   : > { %1635 = vadd.xlane.f32.xlu1 %v1634_v20  ;;  %1632 = vadd.xlane.f32.xlu0 %v1631_v26 }
 0xac6   : > { %v1627_v52 = vpop.xlane.xlu0 %1626 }
 0xac7   : > { %v1637_v53 = vmul.f32 0.03125, %v1627_v52 }
 0xac8   : > { %v1630_v54 = vpop.xlane.xlu1 %1629 }
 0xac9   : > { %v1641_v55 = vadd.f32 1e-05, %v1637_v53  ;;  %v1638_v56 = vmul.f32 0.03125, %v1630_v54 }
 0xacb   : > { %2435 = vrsqrt.f32 %v1641_v55  ;;  %v1642_v57 = vadd.f32 1e-05, %v1638_v56 }
 0xacc   : > { %v1636_v58 = vpop.xlane.xlu1 %1635  ;;  %v1633_v59 = vpop.xlane.xlu0 %1632 }
 0xacd   : > { %2437 = vrsqrt.f32 %v1642_v57  ;;  %v1640_v60 = vmul.f32 0.03125, %v1636_v58  ;;  %v1639_v61 = vmul.f32 0.03125, %v1633_v59 }
 0xacf   : > { %v1644_v62 = vadd.f32 1e-05, %v1640_v60  ;;  %v1643_v63 = vadd.f32 1e-05, %v1639_v61 }
 0xad1   : > { %2439 = vrsqrt.f32 %v1644_v62 }
 0xad2   : > { %2441 = vrsqrt.f32 %v1643_v63 }
 0xad5   : > { %v2436_v0 = vpop.eup %2435 }
 0xad6   : > { %v1649_v2 = vmul.f32 %v2436_v0, %v1617_v41 }
 0xad7   : > { %v2438_v3 = vpop.eup %2437 }
 0xad8   : > { %v1650_v4 = vmul.f32 %v2438_v3, %v1618_v23  ;;  %v1657_v5 = vmul.f32 %v2098_v1, %v1649_v2 }
 0xada   : > { %v1658_v9 = vmul.f32 %v2098_v1, %v1650_v4  ;;  %v1665_v16 = vadd.f32 %v2099_v6, %v1657_v5 }
 0xadb   : > { %v2440_v10 = vpop.eup %2439 }
 0xadc   : > { %v2442_v11 = vpop.eup %2441  ;;  %v1652_v13 = vmul.f32 %v2440_v10, %v1620_v45  ;;  %v1666_v17 = vadd.f32 %v2099_v6, %v1658_v9 }
 0xadd   : > { %v1651_v19 = vmul.f32 %v2442_v11, %v1619_v8 }
 0xade   : > { %v1660_v15 = vmul.f32 %v2098_v1, %v1652_v13  ;;  %v1669_v21 = vpack.c.bf16 %v1666_v17, %v1665_v16 }
 0xadf   : > { %v1659_v14 = vmul.f32 %v2098_v1, %v1651_v19 }
 0xae0   : > { %2280 = vmatprep.mubr.msk.bf16.mxu0 %vm396_vm0, %v1669_v21  ;;  %v1668_v22 = vadd.f32 %v2099_v6, %v1660_v15 }
 0xae1   : > { %v1667_v18 = vadd.f32 %v2099_v6, %v1659_v14 }
 0xae3   : > { %v1670_v12 = vpack.c.bf16 %v1668_v22, %v1667_v18 }
 0xae5   : > { %2281 = vmatmul.mubr.msk.bf16.vlgmr.msra.gmra.mrb[16].mxu0 %vm396_vm0, %v1670_v12 }
 0xae6   : > { %2285 = vmatpush3.bf16.msra.mxu0 %v2355_v25 }
 0xae7   : > { %2286 = vmatprep.subr.bf16.mxu0 %v2356_v27 }
 0xaea   : > { %2287 = vmatpush3.bf16.msra.mxu0 %v2356_v27 }
 0xaeb   : > { %2288 = vmatprep.subr.bf16.mxu0 %v2357_v33 }
 0xaee   : > { %2289 = vmatpush3.bf16.msra.mxu0 %v2357_v33 }
 0xaef   : > { %2290 = vmatprep.subr.bf16.mxu0 %v2358_v35 }
 0xaf2   : > { %2291 = vmatpush3.bf16.msra.mxu0 %v2358_v35 }
 0xaf3   : > { %2292 = vmatprep.subr.bf16.mxu0 %v2359_v36 }
 0xaf6   : > { %2293 = vmatpush3.bf16.msra.mxu0 %v2359_v36 }
 0xaf7   : > { %2294 = vmatprep.subr.bf16.mxu0 %v2360_v37 }
 0xafa   : > { %2295 = vmatpush3.bf16.msra.mxu0 %v2360_v37 }
 0xafb   : > { %2296 = vmatprep.subr.bf16.mxu0 %v2361_v38 }
 0xafe   : > { %2297 = vmatpush3.bf16.msra.mxu0 %v2361_v38 }
 0xaff   : > { %2298 = vmatprep.subr.bf16.mxu0 %v2362_v39 }
 0xb02   : > { %2299 = vmatpush3.bf16.msra.mxu0 %v2362_v39 }
 0xbb8   : > { %v2282_v41 = vpop.f32.mrb[16].mxu0 }
 0xbb9   : > { %v2917_v42 = vadd.f32 %v2282_v41, %v2100_v40  ;;  %v1734_v43 = vpop.f32.mrb[17].mxu0 }
 0xbba   : > { %v2919_v23 = vadd.f32 %v2100_v40, %v1734_v43  ;;  %v2283_v29 = vpop.f32.mrb[18].mxu0 }
 0xbbb   : > { %v2922_v32 = vmul.f32 0.70710677, %v2917_v42  ;;  %v2924_v44 = vadd.f32 %v2283_v29, %v2100_v40  ;;  %v1737_v45 = vpop.f32.mrb[19].mxu0 }
 0xbbc   : > { %v2927_v46 = vmul.f32 0.70710677, %v2919_v23  ;;  %v2929_v7 = vadd.f32 %v2100_v40, %v1737_v45 }
 0xbbd   : > { %v1759_v47 = vand.u32 2147483647, %v2922_v32  ;;  %v2933_v8 = vmul.f32 0.70710677, %v2924_v44  ;;  %vm1839_vm7 = vcmp.ge.f32.partialorder %v2922_v32, 0.0 }
 0xbbe   : > { %v1757_v48 = vand.u32 2147483647, %v2927_v46  ;;  %v2937_v49 = vmul.f32 0.70710677, %v2929_v7  ;;  %vm1837_vm8 = vcmp.ge.f32.partialorder %v2927_v46, 0.0 }
 0xbbf   : > { %v1763_v50 = vmul.f32 0.3275911, %v1759_v47  ;;  %v1760_v20 = vand.u32 2147483647, %v2933_v8  ;;  %v1815_v57 = vsub.f32 0.0, %v1759_v47  ;;  %vm1840_vm9 = vcmp.ge.f32.partialorder %v2933_v8, 0.0 }
 0xbc0   : > { %v1761_v26 = vmul.f32 0.3275911, %v1757_v48  ;;  %v1758_v28 = vand.u32 2147483647, %v2937_v49  ;;  %v1813_v58 = vsub.f32 0.0, %v1757_v48  ;;  %vm1838_vm10 = vcmp.ge.f32.partialorder %v2937_v49, 0.0 }
 0xbc1   : > { %v1767_v51 = vadd.f32 1.0, %v1763_v50  ;;  %v1764_v52 = vmul.f32 0.3275911, %v1760_v20  ;;  %v1819_v60 = vmul.f32 %v1815_v57, %v1759_v47  ;;  %v1816_v61 = vsub.f32 0.0, %v1760_v20 }
 0xbc2   : > { %v1765_v53 = vadd.f32 1.0, %v1761_v26  ;;  %v1762_v54 = vmul.f32 0.3275911, %v1758_v28  ;;  %v1817_v0 = vmul.f32 %v1813_v58, %v1757_v48  ;;  %v1814_v2 = vsub.f32 0.0, %v1758_v28 }
 0xbc3   : > { %2443 = vrcp.f32 %v1767_v51  ;;  %v1768_v55 = vadd.f32 1.0, %v1764_v52  ;;  %v1825_v5 = vmul.f32 1.442695, %v1819_v60  ;;  %v1820_v9 = vmul.f32 %v1816_v61, %v1760_v20 }
 0xbc4   : > { %2445 = vrcp.f32 %v1765_v53  ;;  %v1766_v56 = vadd.f32 1.0, %v1762_v54  ;;  %v1821_v11 = vmul.f32 1.442695, %v1817_v0  ;;  %v1818_v19 = vmul.f32 %v1814_v2, %v1758_v28 }
 0xbc5   : > { %2447 = vrcp.f32 %v1768_v55  ;;  %v1827_v18 = vmul.f32 1.442695, %v1820_v9 }
 0xbc6   : > { %2449 = vrcp.f32 %v1766_v56  ;;  %v1823_v35 = vmul.f32 1.442695, %v1818_v19 }
 0xbc7   : > { %2451 = vpow2.f32 %v1825_v5 }
 0xbc8   : > { %2453 = vpow2.f32 %v1821_v11 }
 0xbc9   : > { %2455 = vpow2.f32 %v1827_v18 }
 0xbca   : > { %2457 = vpow2.f32 %v1823_v35 }
 0xbcd   : > { %v2444_v59 = vpop.eup %2443 }
 0xbce   : > { %v2446_v62 = vpop.eup %2445  ;;  %v1779_v63 = vmul.f32 1.0614054, %v2444_v59 }
 0xbcf   : > { %v1777_v1 = vmul.f32 1.0614054, %v2446_v62  ;;  %v2448_v4 = vpop.eup %2447 }
 0xbd0   : > { %v1783_v3 = vadd.f32 -1.4531521, %v1779_v63  ;;  %v1780_v13 = vmul.f32 1.0614054, %v2448_v4  ;;  %v2450_v16 = vpop.eup %2449 }
 0xbd1   : > { %v1781_v6 = vadd.f32 -1.4531521, %v1777_v1  ;;  %v1778_v14 = vmul.f32 1.0614054, %v2450_v16  ;;  %v2452_v51 = vpop.eup %2451 }
 0xbd2   : > { %v1787_v10 = vmul.f32 %v2444_v59, %v1783_v3  ;;  %v1784_v21 = vadd.f32 -1.4531521, %v1780_v13  ;;  %v2454_v53 = vpop.eup %2453 }
 0xbd3   : > { %v1785_v17 = vmul.f32 %v2446_v62, %v1781_v6  ;;  %v1782_v27 = vadd.f32 -1.4531521, %v1778_v14  ;;  %v2456_v63 = vpop.eup %2455  ;;  %v1749_v14 = vmul.f32 0.5, %v2919_v23 }
 0xbd4   : > { %v1791_v15 = vadd.f32 1.4214138, %v1787_v10  ;;  %v1788_v25 = vmul.f32 %v2448_v4, %v1784_v21  ;;  %v2458_v5 = vpop.eup %2457  ;;  %v1752_v21 = vmul.f32 0.5, %v2924_v44  ;;  %v2105_v44 = vld [vmem:[%s2978_s10] ss:$0 sm:$0xff] }
 0xbd5   : > { %v1789_v22 = vadd.f32 1.4214138, %v1785_v17  ;;  %v1786_v38 = vmul.f32 %v2450_v16, %v1782_v27 }
 0xbd6   : > { %v1795_v12 = vmul.f32 %v2444_v59, %v1791_v15  ;;  %v1792_v37 = vadd.f32 1.4214138, %v1788_v25 }
 0xbd7   : > { %v1793_v33 = vmul.f32 %v2446_v62, %v1789_v22  ;;  %v1790_v43 = vadd.f32 1.4214138, %v1786_v38 }
 0xbd8   : > { %v1799_v36 = vadd.f32 -0.28449672, %v1795_v12  ;;  %v1796_v41 = vmul.f32 %v2448_v4, %v1792_v37  ;;  %v1750_v12 = vmul.f32 0.5, %v2929_v7 }
 0xbd9   : > { %v1797_v39 = vadd.f32 -0.28449672, %v1793_v33  ;;  %v1794_v48 = vmul.f32 %v2450_v16, %v1790_v43 }
 0xbda   : > { %v1803_v40 = vmul.f32 %v2444_v59, %v1799_v36  ;;  %v1800_v47 = vadd.f32 -0.28449672, %v1796_v41 }
 0xbdb   : > { %v1801_v29 = vmul.f32 %v2446_v62, %v1797_v39  ;;  %v1798_v28 = vadd.f32 -0.28449672, %v1794_v48 }
 0xbdc   : > { %v1807_v45 = vadd.f32 0.2548296, %v1803_v40  ;;  %v1804_v26 = vmul.f32 %v2448_v4, %v1800_v47 }
 0xbdd   : > { %v1805_v50 = vadd.f32 0.2548296, %v1801_v29  ;;  %v1802_v56 = vmul.f32 %v2450_v16, %v1798_v28 }
 0xbde   : > { %v1811_v20 = vmul.f32 %v2444_v59, %v1807_v45  ;;  %v1808_v55 = vadd.f32 0.2548296, %v1804_v26 }
 0xbdf   : > { %v1809_v52 = vmul.f32 %v2446_v62, %v1805_v50  ;;  %v1806_v61 = vadd.f32 0.2548296, %v1802_v56 }
 0xbe0   : > { %v1831_v54 = vmul.f32 %v2452_v51, %v1811_v20  ;;  %v1812_v60 = vmul.f32 %v2448_v4, %v1808_v55  ;;  %v1751_v4 = vmul.f32 0.5, %v2917_v42 }
 0xbe1   : > { %v1829_v57 = vmul.f32 %v2454_v53, %v1809_v52  ;;  %v1810_v3 = vmul.f32 %v2450_v16, %v1806_v61 }
 0xbe2   : > { %v1835_v58 = vsub.f32 1.0, %v1831_v54  ;;  %v1832_v2 = vmul.f32 %v2456_v63, %v1812_v60 }
 0xbe3   : > { %v1833_v0 = vsub.f32 1.0, %v1829_v57  ;;  %v1830_v62 = vmul.f32 %v2458_v5, %v1810_v3 }
 0xbe4   : > { %v1843_v1 = vsub.f32 0.0, %v1835_v58  ;;  %v1836_v9 = vsub.f32 1.0, %v1832_v2 }
 0xbe5   : > { %v1841_v59 = vsub.f32 0.0, %v1833_v0  ;;  %v1834_v13 = vsub.f32 1.0, %v1830_v62 }
 0xbe6   : > { %v1847_v6 = vsel %vm1839_vm7, %v1835_v58, %v1843_v1  ;;  %v1844_v11 = vsub.f32 0.0, %v1836_v9 }
 0xbe7   : > { %v1845_v10 = vsel %vm1837_vm8, %v1833_v0, %v1841_v59  ;;  %v1851_v17 = vadd.f32 1.0, %v1847_v6  ;;  %v1842_v15 = vsub.f32 0.0, %v1834_v13 }
 0xbe8   : > { %v1848_v19 = vsel %vm1840_vm9, %v1836_v9, %v1844_v11  ;;  %v1849_v16 = vadd.f32 1.0, %v1845_v10 }
 0xbe9   : > { %v1852_v32 = vadd.f32 1.0, %v1848_v19  ;;  %v1846_v46 = vsel %vm1838_vm10, %v1834_v13, %v1842_v15  ;;  %v1855_v22 = vmul.f32 %v1851_v17, %v1751_v4 }
 0xbea   : > { %v1850_v25 = vadd.f32 1.0, %v1846_v46  ;;  %v1853_v8 = vmul.f32 %v1849_v16, %v1749_v14 }
 0xbeb   : > { %v1856_v18 = vmul.f32 %v1852_v32, %v1752_v21 }
 0xbec   : > { %v1854_v42 = vmul.f32 %v1850_v25, %v1750_v12 }
 0xbed   : > { %v1858_v27 = vpack.c.bf16 %v1856_v18, %v1855_v22 }
 0xbee   : > { %v1857_v33 = vpack.c.bf16 %v1854_v42, %v1853_v8 }
 0xbf0   : > { %2300 = vmatprep.mubr.bf16.mxu0 %v1857_v33 }
 0xbf1   : > { %2301 = vmatmul.mubr.bf16.vlgmr.msra.gmra.mrb[20].mxu0 %v1858_v27 }
 0xcc4   : > { %v2302_v49 = vpop.f32.mrb[20].mxu0 }
 0xcc5   : > { %v1973_v35 = vadd.f32 %v2302_v49, %v2105_v44  ;;  %v1964_v23 = vpop.f32.mrb[21].mxu0 }
 0xcc6   : > { %v1965_v7 = vadd.f32 %v2105_v44, %v1964_v23  ;;  %v2303_v36 = vpop.f32.mrb[22].mxu0 }
 0xcc7   : > { %v1981_v37 = vadd.f32 %v1973_v35, %v2860_v34  ;;  %v1976_v38 = vadd.f32 %v2303_v36, %v2105_v44  ;;  %v1967_v39 = vpop.f32.mrb[23].mxu0 }
 0xcc8   : > { %v1979_v40 = vadd.f32 %v1965_v7, %v2851_v24  ;;  %v1968_v41 = vadd.f32 %v2105_v44, %v1967_v39 }
 0xcc9   : > { %1985 = vst.msk [vmem:[%s386_s24 + $0x10] sm:$0xff] %vm396_vm0, %v1981_v37  ;;  %v1982_v43 = vadd.f32 %v1976_v38, %v2854_v30 }
 0xcca   : > { %1983 = vst.msk [vmem:[%s386_s24] sm:$0xff] %vm396_vm0, %v1979_v40  ;;  %v1980_v29 = vadd.f32 %v1968_v41, %v2856_v31 }
 0xccb   : > { %1986 = vst.msk [vmem:[%s386_s24 + $0x18] sm:$0xf] %vm406_vm1, %v1982_v43 }
 0xccc   : > { %1984 = vst.msk [vmem:[%s386_s24 + $0x8] sm:$0xff] %vm396_vm0, %v1980_v29 }
 0xccd PF: > { %s21_s17 = sadd.s32 1, %s2469_s17  }
 0xcce   : > { %p18_p4 = scmp.ge.s32.totalorder %s21_s17, 4  }
 0xcd0   :  { %20 = sbr.rel (!%p18_p4) target bundleno = 1 (0x1), region = 100 }

</bundles_post_ra>
